<compile_context>
chip_gen: v7x
topology: tpu7x:2x2x1
jax: 0.10.0
libtpu: 0.0.40
codegen_flags: <defaults>
</compile_context>

<pallas_src>
import functools

import jax
import jax.numpy as jnp
from jax.experimental import pallas as pl
from jax.experimental.pallas import tpu as pltpu


def _round_up(x, m):
    return ((x + m - 1) // m) * m


# ---------------------------------------------------------------------------
# Pallas kernels
# ---------------------------------------------------------------------------
def _matmul_bias_kernel(a_ref, b_ref, bias_ref, o_ref, *, relu):
    acc = jnp.dot(a_ref[...], b_ref[...], preferred_element_type=jnp.float32)
    acc = acc + bias_ref[...]          # (M,1) or (1,TN) broadcast
    if relu:
        acc = jnp.maximum(acc, 0.0)
    o_ref[...] = acc.astype(o_ref.dtype)


def matmul_bias_act(a, b, bias, relu, tn_max=512):
    """a: (M, K), b: (K, N), bias: (M, 1) or (1, N) float32 -> (M, N) float32.

    Grid over the N (column) axis; N is zero-padded to a multiple of the tile
    so every store is lane-dense and unmasked.  a/b are cast to bf16 for the
    MXU, accumulation stays f32.
    """
    M, K = a.shape
    N = b.shape[1]
    TN = min(tn_max, _round_up(N, 128))
    Np = _round_up(N, TN)

    a16 = a.astype(jnp.bfloat16)
    b16 = b.astype(jnp.bfloat16)
    if Np != N:
        b16 = jnp.pad(b16, ((0, 0), (0, Np - N)))

    bias_per_row = bias.shape == (M, 1)
    if bias_per_row:
        bias_arg = bias
        bias_spec = pl.BlockSpec((M, 1), lambda j: (0, 0))
    else:
        bias_arg = jnp.pad(bias, ((0, 0), (0, Np - N))) if Np != N else bias
        bias_spec = pl.BlockSpec((1, TN), lambda j: (0, j))

    grid = (Np // TN,)
    flops = 2 * M * K * Np
    bytes_accessed = a16.size * 2 + b16.size * 2 + bias_arg.size * 4 + M * Np * 4

    out = pl.pallas_call(
        functools.partial(_matmul_bias_kernel, relu=relu),
        out_shape=jax.ShapeDtypeStruct((M, Np), jnp.float32),
        grid=grid,
        in_specs=[
            pl.BlockSpec((M, K), lambda j: (0, 0)),    # weights resident
            pl.BlockSpec((K, TN), lambda j: (0, j)),   # streamed column tiles
            bias_spec,
        ],
        out_specs=pl.BlockSpec((M, TN), lambda j: (0, j)),
        compiler_params=pltpu.CompilerParams(dimension_semantics=("parallel",)),
        cost_estimate=pl.CostEstimate(
            flops=flops, transcendentals=0, bytes_accessed=bytes_accessed),
    )(a16, b16, bias_arg)

    return out[:, :N] if Np != N else out


def _maxpool_kernel(x_ref, o_ref, *, w):
    t = x_ref[...]                                   # (TR, 2*w): [even row | odd row]
    v = jnp.maximum(t[:, :w], t[:, w:])              # vertical 2-max
    o_ref[...] = jnp.maximum(v[:, :w - 1], v[:, 1:])  # neighbor max (width w-1)


def maxpool2x2(x):
    """x: (C, B, H, W) with even H, W -> (C, B, H//2, W//2)."""
    C, B, H, W = x.shape
    Hp, Wp = H // 2, W // 2
    R = C * B * Hp
    xr = x.reshape(R, 2 * W)                 # contiguous (free) reshape
    TR = R if R <= 256 else 256
    out = pl.pallas_call(
        functools.partial(_maxpool_kernel, w=W),
        out_shape=jax.ShapeDtypeStruct((R, W - 1), x.dtype),
        grid=(pl.cdiv(R, TR),),
        in_specs=[pl.BlockSpec((TR, 2 * W), lambda i: (i, 0))],
        out_specs=pl.BlockSpec((TR, W - 1), lambda i: (i, 0)),
        compiler_params=pltpu.CompilerParams(dimension_semantics=("parallel",)),
    )(xr)
    # pooled value for window column j sits at lane 2*j
    return out[:, 0::2].reshape(C, B, Hp, Wp)


# ---------------------------------------------------------------------------
# Glue: im2col + layer wrappers (plain JAX reshapes/slices only)
# ---------------------------------------------------------------------------
def im2col_cfirst(x, k, pad):
    """x: (C, B, H, W) -> cols (C*k*k, B*Ho*Wo), rows ordered (cin, kh, kw)
    to match PyTorch's (Cout, Cin, kh, kw) weight flattening."""
    # TODO(synk): build the k*k patch columns inside the conv kernel from a
    # VMEM-resident tile (shifted slices) to avoid the k*k-amplified XLA copy.
    if pad:
        x = jnp.pad(x, ((0, 0), (0, 0), (pad, pad), (pad, pad)))
    C, B, H, W = x.shape
    Ho, Wo = H - k + 1, W - k + 1
    patches = [x[:, :, i:i + Ho, j:j + Wo] for i in range(k) for j in range(k)]
    p = jnp.stack(patches, axis=1)           # (C, k*k, B, Ho, Wo)
    return p.reshape(C * k * k, B * Ho * Wo), Ho, Wo


def conv2d_relu(x, w2d, b_col, k, pad, relu=True):
    """x: (Cin, B, H, W), w2d: (Cout, Cin*k*k), b_col: (Cout, 1)
    -> (Cout, B, Ho, Wo)."""
    Cout = w2d.shape[0]
    B = x.shape[1]
    cols, Ho, Wo = im2col_cfirst(x, k, pad)
    out = matmul_bias_act(w2d, cols, b_col, relu=relu)   # (Cout, B*Ho*Wo), lane-dense
    return out.reshape(Cout, B, Ho, Wo)


# ---------------------------------------------------------------------------
# Net parameters (deterministic synthetic init, PyTorch layout) + prep
# ---------------------------------------------------------------------------
def init_params(key):
    def conv_p(k, cout, cin, ksz, scale=0.1):
        k1, k2 = jax.random.split(k)
        return (jax.random.normal(k1, (cout, cin, ksz, ksz), jnp.float32) * scale,
                jax.random.normal(k2, (cout,), jnp.float32) * scale)

    def fc_p(k, cin, cout, scale=0.05):
        k1, k2 = jax.random.split(k)
        return (jax.random.normal(k1, (cout, cin), jnp.float32) * scale,
                jax.random.normal(k2, (cout,), jnp.float32) * scale)

    ks = jax.random.split(key, 7)
    return {
        "conv1": conv_p(ks[0], 6, 3, 5),
        "conv2": conv_p(ks[1], 12, 6, 3),
        "conv3": conv_p(ks[2], 24, 12, 3),
        "conv4": conv_p(ks[3], 16, 24, 5),
        "fc1": fc_p(ks[4], 16 * 5 * 5, 120),
        "fc2": fc_p(ks[5], 120, 84),
        "fc3": fc_p(ks[6], 84, 10),
    }


def prepare_params(params):
    """One-time layout prep: conv weights flattened to (Cout, Cin*k*k), conv
    bias as a column; FC weights pre-transposed to (in, out), bias as a row."""
    prep = {}
    for name in ("conv1", "conv2", "conv3", "conv4"):
        w, b = params[name]
        cout = w.shape[0]
        prep[name + "_w"] = w.reshape(cout, -1)
        prep[name + "_b"] = b.reshape(cout, 1)
    for name in ("fc1", "fc2", "fc3"):
        w, b = params[name]
        prep[name + "_w"] = w.T                     # (in, out)
        prep[name + "_b"] = b.reshape(1, -1)
    return prep


def net_forward(prep, x):
    # x: (B, 3, 32, 32) NCHW float32 (PyTorch convention at the boundary).
    B = x.shape[0]
    xc = jnp.transpose(x, (1, 0, 2, 3))                               # (3, B, 32, 32)
    xc = conv2d_relu(xc, prep["conv1_w"], prep["conv1_b"], k=5, pad=0)  # (6, B, 28, 28)
    xc = maxpool2x2(xc)                                               # (6, B, 14, 14)
    xc = conv2d_relu(xc, prep["conv2_w"], prep["conv2_b"], k=3, pad=1)  # (12, B, 14, 14)
    xc = conv2d_relu(xc, prep["conv3_w"], prep["conv3_b"], k=3, pad=1)  # (24, B, 14, 14)
    xc = conv2d_relu(xc, prep["conv4_w"], prep["conv4_b"], k=5, pad=0)  # (16, B, 10, 10)
    xc = maxpool2x2(xc)                                               # (16, B, 5, 5)
    # Match torch x.view(-1, 16*5*5): per-sample (C, H, W) C-major flatten.
    flat = jnp.transpose(xc, (1, 0, 2, 3)).reshape(B, 16 * 5 * 5)     # (B, 400)
    h = matmul_bias_act(flat, prep["fc1_w"], prep["fc1_b"], relu=True)   # (B, 120)
    h = matmul_bias_act(h, prep["fc2_w"], prep["fc2_b"], relu=True)      # (B, 84)
    h = matmul_bias_act(h, prep["fc3_w"], prep["fc3_b"], relu=False)     # (B, 10)
    return h


if __name__ == "__main__":
    key = jax.random.PRNGKey(0)
    pkey, xkey = jax.random.split(key)
    params = init_params(pkey)
    prep = prepare_params(params)
    # Spatial size 32 / 3 channels are forced by the 16*5*5 flatten in the module.
    x = jax.random.normal(xkey, (2, 3, 32, 32), jnp.float32)

    out = jax.jit(net_forward)(prep, x)
    out = jax.block_until_ready(out)

    assert out.shape == (2, 10), out.shape
    assert out.dtype == jnp.float32
    print("KERNEL_OK")
</pallas_src>

<mosaic_0001>
module attributes {stable_mosaic.version = 11 : i64} {
  func.func @_matmul_bias_kernel(%arg0: i32, %arg1: memref<6x75xbf16, #tpu.memory_space<vmem>>, %arg2: memref<75x512xbf16, #tpu.memory_space<vmem>>, %arg3: memref<6x1xf32, #tpu.memory_space<vmem>>, %arg4: memref<6x512xf32, #tpu.memory_space<vmem>>) attributes {dimension_semantics = [#tpu.dimension_semantics<parallel>], iteration_bounds = array<i64: 4>, scalar_prefetch = 0 : i64, scratch_operands = 0 : i64, tpu.core_type = #tpu.core_type<tc>, window_params = [{pipeline_mode = #tpu.pipeline_mode<synchronous>, transform_indices = @transform_0, window_bounds = array<i64: 6, 75>}, {transform_indices = @transform_1, window_bounds = array<i64: 75, 512>}, {pipeline_mode = #tpu.pipeline_mode<synchronous>, transform_indices = @transform_2, window_bounds = array<i64: 6, 1>}, {transform_indices = @transform_3, window_bounds = array<i64: 6, 512>}]} {
    %c0 = arith.constant 0 : index
    %c0_0 = arith.constant 0 : index
    %0 = vector.load %arg1[%c0, %c0_0] : memref<6x75xbf16, #tpu.memory_space<vmem>>, vector<6x75xbf16>
    %c0_1 = arith.constant 0 : index
    %c0_2 = arith.constant 0 : index
    %1 = vector.load %arg2[%c0_1, %c0_2] : memref<75x512xbf16, #tpu.memory_space<vmem>>, vector<75x512xbf16>
    %cst = arith.constant dense<0.000000e+00> : vector<6x512xf32>
    %2 = tpu.matmul %0, %1, %cst {dimension_numbers = #tpu.dot_dimension_numbers<[1], [0], [0], [1], [0, 0, 1, 1], [], []>} : vector<6x75xbf16>, vector<75x512xbf16>, vector<6x512xf32> -> vector<6x512xf32>
    %c0_3 = arith.constant 0 : index
    %c0_4 = arith.constant 0 : index
    %3 = vector.load %arg3[%c0_3, %c0_4] : memref<6x1xf32, #tpu.memory_space<vmem>>, vector<6x1xf32>
    %4 = vector.broadcast %3 : vector<6x1xf32> to vector<6x512xf32>
    %5 = arith.addf %2, %4 : vector<6x512xf32>
    %cst_5 = arith.constant 0.000000e+00 : f32
    %6 = vector.broadcast %cst_5 : f32 to vector<6x512xf32>
    %7 = arith.maximumf %5, %6 : vector<6x512xf32>
    %c0_6 = arith.constant 0 : index
    %c0_7 = arith.constant 0 : index
    %8 = vector.load %arg4[%c0_6, %c0_7] : memref<6x512xf32, #tpu.memory_space<vmem>>, vector<6x512xf32>
    tpu.vector_store %arg4[%c0_6, %c0_7], %7 {strides = array<i32>} : memref<6x512xf32, #tpu.memory_space<vmem>>, vector<6x512xf32>,
    return
  }
  func.func @transform_0(%arg0: i32) -> (i32, i32) {
    %c0_i32 = arith.constant 0 : i32
    %c0_i32_0 = arith.constant 0 : i32
    %c0_i32_1 = arith.constant 0 : i32
    return %c0_i32, %c0_i32_0 : i32, i32
  }
  func.func @transform_1(%arg0: i32) -> (i32, i32) {
    %c0_i32 = arith.constant 0 : i32
    %c0_i32_0 = arith.constant 0 : i32
    return %c0_i32, %arg0 : i32, i32
  }
  func.func @transform_2(%arg0: i32) -> (i32, i32) {
    %c0_i32 = arith.constant 0 : i32
    %c0_i32_0 = arith.constant 0 : i32
    %c0_i32_1 = arith.constant 0 : i32
    return %c0_i32, %c0_i32_0 : i32, i32
  }
  func.func @transform_3(%arg0: i32) -> (i32, i32) {
    %c0_i32 = arith.constant 0 : i32
    %c0_i32_0 = arith.constant 0 : i32
    return %c0_i32, %arg0 : i32, i32
  }
}

module attributes {stable_mosaic.version = 11 : i64} {
  func.func @_maxpool_kernel(%arg0: i32, %arg1: memref<168x56xf32, #tpu.memory_space<vmem>>, %arg2: memref<168x27xf32, #tpu.memory_space<vmem>>) attributes {dimension_semantics = [#tpu.dimension_semantics<parallel>], iteration_bounds = array<i64: 1>, scalar_prefetch = 0 : i64, scratch_operands = 0 : i64, tpu.core_type = #tpu.core_type<tc>, window_params = [{transform_indices = @transform_0, window_bounds = array<i64: 168, 56>}, {transform_indices = @transform_1, window_bounds = array<i64: 168, 27>}]} {
    %c0 = arith.constant 0 : index
    %c0_0 = arith.constant 0 : index
    %0 = vector.load %arg1[%c0, %c0_0] : memref<168x56xf32, #tpu.memory_space<vmem>>, vector<168x56xf32>
    %1 = vector.extract_strided_slice %0 {offsets = [0, 0], sizes = [168, 28], strides = [1, 1]} : vector<168x56xf32> to vector<168x28xf32>
    %2 = vector.extract_strided_slice %0 {offsets = [0, 28], sizes = [168, 28], strides = [1, 1]} : vector<168x56xf32> to vector<168x28xf32>
    %3 = arith.maximumf %1, %2 : vector<168x28xf32>
    %4 = vector.extract_strided_slice %3 {offsets = [0, 0], sizes = [168, 27], strides = [1, 1]} : vector<168x28xf32> to vector<168x27xf32>
    %5 = vector.extract_strided_slice %3 {offsets = [0, 1], sizes = [168, 27], strides = [1, 1]} : vector<168x28xf32> to vector<168x27xf32>
    %6 = arith.maximumf %4, %5 : vector<168x27xf32>
    %c0_1 = arith.constant 0 : index
    %c0_2 = arith.constant 0 : index
    %7 = vector.load %arg2[%c0_1, %c0_2] : memref<168x27xf32, #tpu.memory_space<vmem>>, vector<168x27xf32>
    tpu.vector_store %arg2[%c0_1, %c0_2], %6 {strides = array<i32>} : memref<168x27xf32, #tpu.memory_space<vmem>>, vector<168x27xf32>,
    return
  }
  func.func @transform_0(%arg0: i32) -> (i32, i32) {
    %c0_i32 = arith.constant 0 : i32
    %c0_i32_0 = arith.constant 0 : i32
    return %arg0, %c0_i32 : i32, i32
  }
  func.func @transform_1(%arg0: i32) -> (i32, i32) {
    %c0_i32 = arith.constant 0 : i32
    %c0_i32_0 = arith.constant 0 : i32
    return %arg0, %c0_i32 : i32, i32
  }
}

module attributes {stable_mosaic.version = 11 : i64} {
  func.func @_matmul_bias_kernel(%arg0: i32, %arg1: memref<12x54xbf16, #tpu.memory_space<vmem>>, %arg2: memref<54x512xbf16, #tpu.memory_space<vmem>>, %arg3: memref<12x1xf32, #tpu.memory_space<vmem>>, %arg4: memref<12x512xf32, #tpu.memory_space<vmem>>) attributes {dimension_semantics = [#tpu.dimension_semantics<parallel>], iteration_bounds = array<i64: 1>, scalar_prefetch = 0 : i64, scratch_operands = 0 : i64, tpu.core_type = #tpu.core_type<tc>, window_params = [{pipeline_mode = #tpu.pipeline_mode<synchronous>, transform_indices = @transform_0, window_bounds = array<i64: 12, 54>}, {transform_indices = @transform_1, window_bounds = array<i64: 54, 512>}, {pipeline_mode = #tpu.pipeline_mode<synchronous>, transform_indices = @transform_2, window_bounds = array<i64: 12, 1>}, {transform_indices = @transform_3, window_bounds = array<i64: 12, 512>}]} {
    %c0 = arith.constant 0 : index
    %c0_0 = arith.constant 0 : index
    %0 = vector.load %arg1[%c0, %c0_0] : memref<12x54xbf16, #tpu.memory_space<vmem>>, vector<12x54xbf16>
    %c0_1 = arith.constant 0 : index
    %c0_2 = arith.constant 0 : index
    %1 = vector.load %arg2[%c0_1, %c0_2] : memref<54x512xbf16, #tpu.memory_space<vmem>>, vector<54x512xbf16>
    %cst = arith.constant dense<0.000000e+00> : vector<12x512xf32>
    %2 = tpu.matmul %0, %1, %cst {dimension_numbers = #tpu.dot_dimension_numbers<[1], [0], [0], [1], [0, 0, 1, 1], [], []>} : vector<12x54xbf16>, vector<54x512xbf16>, vector<12x512xf32> -> vector<12x512xf32>
    %c0_3 = arith.constant 0 : index
    %c0_4 = arith.constant 0 : index
    %3 = vector.load %arg3[%c0_3, %c0_4] : memref<12x1xf32, #tpu.memory_space<vmem>>, vector<12x1xf32>
    %4 = vector.broadcast %3 : vector<12x1xf32> to vector<12x512xf32>
    %5 = arith.addf %2, %4 : vector<12x512xf32>
    %cst_5 = arith.constant 0.000000e+00 : f32
    %6 = vector.broadcast %cst_5 : f32 to vector<12x512xf32>
    %7 = arith.maximumf %5, %6 : vector<12x512xf32>
    %c0_6 = arith.constant 0 : index
    %c0_7 = arith.constant 0 : index
    %8 = vector.load %arg4[%c0_6, %c0_7] : memref<12x512xf32, #tpu.memory_space<vmem>>, vector<12x512xf32>
    tpu.vector_store %arg4[%c0_6, %c0_7], %7 {strides = array<i32>} : memref<12x512xf32, #tpu.memory_space<vmem>>, vector<12x512xf32>,
    return
  }
  func.func @transform_0(%arg0: i32) -> (i32, i32) {
    %c0_i32 = arith.constant 0 : i32
    %c0_i32_0 = arith.constant 0 : i32
    %c0_i32_1 = arith.constant 0 : i32
    return %c0_i32, %c0_i32_0 : i32, i32
  }
  func.func @transform_1(%arg0: i32) -> (i32, i32) {
    %c0_i32 = arith.constant 0 : i32
    %c0_i32_0 = arith.constant 0 : i32
    return %c0_i32, %arg0 : i32, i32
  }
  func.func @transform_2(%arg0: i32) -> (i32, i32) {
    %c0_i32 = arith.constant 0 : i32
    %c0_i32_0 = arith.constant 0 : i32
    %c0_i32_1 = arith.constant 0 : i32
    return %c0_i32, %c0_i32_0 : i32, i32
  }
  func.func @transform_3(%arg0: i32) -> (i32, i32) {
    %c0_i32 = arith.constant 0 : i32
    %c0_i32_0 = arith.constant 0 : i32
    return %c0_i32, %arg0 : i32, i32
  }
}

module attributes {stable_mosaic.version = 11 : i64} {
  func.func @_matmul_bias_kernel(%arg0: i32, %arg1: memref<24x108xbf16, #tpu.memory_space<vmem>>, %arg2: memref<108x512xbf16, #tpu.memory_space<vmem>>, %arg3: memref<24x1xf32, #tpu.memory_space<vmem>>, %arg4: memref<24x512xf32, #tpu.memory_space<vmem>>) attributes {dimension_semantics = [#tpu.dimension_semantics<parallel>], iteration_bounds = array<i64: 1>, scalar_prefetch = 0 : i64, scratch_operands = 0 : i64, tpu.core_type = #tpu.core_type<tc>, window_params = [{pipeline_mode = #tpu.pipeline_mode<synchronous>, transform_indices = @transform_0, window_bounds = array<i64: 24, 108>}, {transform_indices = @transform_1, window_bounds = array<i64: 108, 512>}, {pipeline_mode = #tpu.pipeline_mode<synchronous>, transform_indices = @transform_2, window_bounds = array<i64: 24, 1>}, {transform_indices = @transform_3, window_bounds = array<i64: 24, 512>}]} {
    %c0 = arith.constant 0 : index
    %c0_0 = arith.constant 0 : index
    %0 = vector.load %arg1[%c0, %c0_0] : memref<24x108xbf16, #tpu.memory_space<vmem>>, vector<24x108xbf16>
    %c0_1 = arith.constant 0 : index
    %c0_2 = arith.constant 0 : index
    %1 = vector.load %arg2[%c0_1, %c0_2] : memref<108x512xbf16, #tpu.memory_space<vmem>>, vector<108x512xbf16>
    %cst = arith.constant dense<0.000000e+00> : vector<24x512xf32>
    %2 = tpu.matmul %0, %1, %cst {dimension_numbers = #tpu.dot_dimension_numbers<[1], [0], [0], [1], [0, 0, 1, 1], [], []>} : vector<24x108xbf16>, vector<108x512xbf16>, vector<24x512xf32> -> vector<24x512xf32>
    %c0_3 = arith.constant 0 : index
    %c0_4 = arith.constant 0 : index
    %3 = vector.load %arg3[%c0_3, %c0_4] : memref<24x1xf32, #tpu.memory_space<vmem>>, vector<24x1xf32>
    %4 = vector.broadcast %3 : vector<24x1xf32> to vector<24x512xf32>
    %5 = arith.addf %2, %4 : vector<24x512xf32>
    %cst_5 = arith.constant 0.000000e+00 : f32
    %6 = vector.broadcast %cst_5 : f32 to vector<24x512xf32>
    %7 = arith.maximumf %5, %6 : vector<24x512xf32>
    %c0_6 = arith.constant 0 : index
    %c0_7 = arith.constant 0 : index
    %8 = vector.load %arg4[%c0_6, %c0_7] : memref<24x512xf32, #tpu.memory_space<vmem>>, vector<24x512xf32>
    tpu.vector_store %arg4[%c0_6, %c0_7], %7 {strides = array<i32>} : memref<24x512xf32, #tpu.memory_space<vmem>>, vector<24x512xf32>,
    return
  }
  func.func @transform_0(%arg0: i32) -> (i32, i32) {
    %c0_i32 = arith.constant 0 : i32
    %c0_i32_0 = arith.constant 0 : i32
    %c0_i32_1 = arith.constant 0 : i32
    return %c0_i32, %c0_i32_0 : i32, i32
  }
  func.func @transform_1(%arg0: i32) -> (i32, i32) {
    %c0_i32 = arith.constant 0 : i32
    %c0_i32_0 = arith.constant 0 : i32
    return %c0_i32, %arg0 : i32, i32
  }
  func.func @transform_2(%arg0: i32) -> (i32, i32) {
    %c0_i32 = arith.constant 0 : i32
    %c0_i32_0 = arith.constant 0 : i32
    %c0_i32_1 = arith.constant 0 : i32
    return %c0_i32, %c0_i32_0 : i32, i32
  }
  func.func @transform_3(%arg0: i32) -> (i32, i32) {
    %c0_i32 = arith.constant 0 : i32
    %c0_i32_0 = arith.constant 0 : i32
    return %c0_i32, %arg0 : i32, i32
  }
}

module attributes {stable_mosaic.version = 11 : i64} {
  func.func @_matmul_bias_kernel(%arg0: i32, %arg1: memref<16x600xbf16, #tpu.memory_space<vmem>>, %arg2: memref<600x256xbf16, #tpu.memory_space<vmem>>, %arg3: memref<16x1xf32, #tpu.memory_space<vmem>>, %arg4: memref<16x256xf32, #tpu.memory_space<vmem>>) attributes {dimension_semantics = [#tpu.dimension_semantics<parallel>], iteration_bounds = array<i64: 1>, scalar_prefetch = 0 : i64, scratch_operands = 0 : i64, tpu.core_type = #tpu.core_type<tc>, window_params = [{pipeline_mode = #tpu.pipeline_mode<synchronous>, transform_indices = @transform_0, window_bounds = array<i64: 16, 600>}, {transform_indices = @transform_1, window_bounds = array<i64: 600, 256>}, {pipeline_mode = #tpu.pipeline_mode<synchronous>, transform_indices = @transform_2, window_bounds = array<i64: 16, 1>}, {transform_indices = @transform_3, window_bounds = array<i64: 16, 256>}]} {
    %c0 = arith.constant 0 : index
    %c0_0 = arith.constant 0 : index
    %0 = vector.load %arg1[%c0, %c0_0] : memref<16x600xbf16, #tpu.memory_space<vmem>>, vector<16x600xbf16>
    %c0_1 = arith.constant 0 : index
    %c0_2 = arith.constant 0 : index
    %1 = vector.load %arg2[%c0_1, %c0_2] : memref<600x256xbf16, #tpu.memory_space<vmem>>, vector<600x256xbf16>
    %cst = arith.constant dense<0.000000e+00> : vector<16x256xf32>
    %2 = tpu.matmul %0, %1, %cst {dimension_numbers = #tpu.dot_dimension_numbers<[1], [0], [0], [1], [0, 0, 1, 1], [], []>} : vector<16x600xbf16>, vector<600x256xbf16>, vector<16x256xf32> -> vector<16x256xf32>
    %c0_3 = arith.constant 0 : index
    %c0_4 = arith.constant 0 : index
    %3 = vector.load %arg3[%c0_3, %c0_4] : memref<16x1xf32, #tpu.memory_space<vmem>>, vector<16x1xf32>
    %4 = vector.broadcast %3 : vector<16x1xf32> to vector<16x256xf32>
    %5 = arith.addf %2, %4 : vector<16x256xf32>
    %cst_5 = arith.constant 0.000000e+00 : f32
    %6 = vector.broadcast %cst_5 : f32 to vector<16x256xf32>
    %7 = arith.maximumf %5, %6 : vector<16x256xf32>
    %c0_6 = arith.constant 0 : index
    %c0_7 = arith.constant 0 : index
    %8 = vector.load %arg4[%c0_6, %c0_7] : memref<16x256xf32, #tpu.memory_space<vmem>>, vector<16x256xf32>
    tpu.vector_store %arg4[%c0_6, %c0_7], %7 {strides = array<i32>} : memref<16x256xf32, #tpu.memory_space<vmem>>, vector<16x256xf32>,
    return
  }
  func.func @transform_0(%arg0: i32) -> (i32, i32) {
    %c0_i32 = arith.constant 0 : i32
    %c0_i32_0 = arith.constant 0 : i32
    %c0_i32_1 = arith.constant 0 : i32
    return %c0_i32, %c0_i32_0 : i32, i32
  }
  func.func @transform_1(%arg0: i32) -> (i32, i32) {
    %c0_i32 = arith.constant 0 : i32
    %c0_i32_0 = arith.constant 0 : i32
    return %c0_i32, %arg0 : i32, i32
  }
  func.func @transform_2(%arg0: i32) -> (i32, i32) {
    %c0_i32 = arith.constant 0 : i32
    %c0_i32_0 = arith.constant 0 : i32
    %c0_i32_1 = arith.constant 0 : i32
    return %c0_i32, %c0_i32_0 : i32, i32
  }
  func.func @transform_3(%arg0: i32) -> (i32, i32) {
    %c0_i32 = arith.constant 0 : i32
    %c0_i32_0 = arith.constant 0 : i32
    return %c0_i32, %arg0 : i32, i32
  }
}

module attributes {stable_mosaic.version = 11 : i64} {
  func.func @_maxpool_kernel(%arg0: i32, %arg1: memref<160x20xf32, #tpu.memory_space<vmem>>, %arg2: memref<160x9xf32, #tpu.memory_space<vmem>>) attributes {dimension_semantics = [#tpu.dimension_semantics<parallel>], iteration_bounds = array<i64: 1>, scalar_prefetch = 0 : i64, scratch_operands = 0 : i64, tpu.core_type = #tpu.core_type<tc>, window_params = [{transform_indices = @transform_0, window_bounds = array<i64: 160, 20>}, {transform_indices = @transform_1, window_bounds = array<i64: 160, 9>}]} {
    %c0 = arith.constant 0 : index
    %c0_0 = arith.constant 0 : index
    %0 = vector.load %arg1[%c0, %c0_0] : memref<160x20xf32, #tpu.memory_space<vmem>>, vector<160x20xf32>
    %1 = vector.extract_strided_slice %0 {offsets = [0, 0], sizes = [160, 10], strides = [1, 1]} : vector<160x20xf32> to vector<160x10xf32>
    %2 = vector.extract_strided_slice %0 {offsets = [0, 10], sizes = [160, 10], strides = [1, 1]} : vector<160x20xf32> to vector<160x10xf32>
    %3 = arith.maximumf %1, %2 : vector<160x10xf32>
    %4 = vector.extract_strided_slice %3 {offsets = [0, 0], sizes = [160, 9], strides = [1, 1]} : vector<160x10xf32> to vector<160x9xf32>
    %5 = vector.extract_strided_slice %3 {offsets = [0, 1], sizes = [160, 9], strides = [1, 1]} : vector<160x10xf32> to vector<160x9xf32>
    %6 = arith.maximumf %4, %5 : vector<160x9xf32>
    %c0_1 = arith.constant 0 : index
    %c0_2 = arith.constant 0 : index
    %7 = vector.load %arg2[%c0_1, %c0_2] : memref<160x9xf32, #tpu.memory_space<vmem>>, vector<160x9xf32>
    tpu.vector_store %arg2[%c0_1, %c0_2], %6 {strides = array<i32>} : memref<160x9xf32, #tpu.memory_space<vmem>>, vector<160x9xf32>,
    return
  }
  func.func @transform_0(%arg0: i32) -> (i32, i32) {
    %c0_i32 = arith.constant 0 : i32
    %c0_i32_0 = arith.constant 0 : i32
    return %arg0, %c0_i32 : i32, i32
  }
  func.func @transform_1(%arg0: i32) -> (i32, i32) {
    %c0_i32 = arith.constant 0 : i32
    %c0_i32_0 = arith.constant 0 : i32
    return %arg0, %c0_i32 : i32, i32
  }
}

module attributes {stable_mosaic.version = 11 : i64} {
  func.func @_matmul_bias_kernel(%arg0: i32, %arg1: memref<2x400xbf16, #tpu.memory_space<vmem>>, %arg2: memref<400x128xbf16, #tpu.memory_space<vmem>>, %arg3: memref<1x128xf32, #tpu.memory_space<vmem>>, %arg4: memref<2x128xf32, #tpu.memory_space<vmem>>) attributes {dimension_semantics = [#tpu.dimension_semantics<parallel>], iteration_bounds = array<i64: 1>, scalar_prefetch = 0 : i64, scratch_operands = 0 : i64, tpu.core_type = #tpu.core_type<tc>, window_params = [{pipeline_mode = #tpu.pipeline_mode<synchronous>, transform_indices = @transform_0, window_bounds = array<i64: 2, 400>}, {transform_indices = @transform_1, window_bounds = array<i64: 400, 128>}, {transform_indices = @transform_2, window_bounds = array<i64: 1, 128>}, {transform_indices = @transform_3, window_bounds = array<i64: 2, 128>}]} {
    %c0 = arith.constant 0 : index
    %c0_0 = arith.constant 0 : index
    %0 = vector.load %arg1[%c0, %c0_0] : memref<2x400xbf16, #tpu.memory_space<vmem>>, vector<2x400xbf16>
    %c0_1 = arith.constant 0 : index
    %c0_2 = arith.constant 0 : index
    %1 = vector.load %arg2[%c0_1, %c0_2] : memref<400x128xbf16, #tpu.memory_space<vmem>>, vector<400x128xbf16>
    %cst = arith.constant dense<0.000000e+00> : vector<2x128xf32>
    %2 = tpu.matmul %0, %1, %cst {dimension_numbers = #tpu.dot_dimension_numbers<[1], [0], [0], [1], [0, 0, 1, 1], [], []>} : vector<2x400xbf16>, vector<400x128xbf16>, vector<2x128xf32> -> vector<2x128xf32>
    %c0_3 = arith.constant 0 : index
    %c0_4 = arith.constant 0 : index
    %3 = vector.load %arg3[%c0_3, %c0_4] : memref<1x128xf32, #tpu.memory_space<vmem>>, vector<1x128xf32>
    %4 = vector.broadcast %3 : vector<1x128xf32> to vector<2x128xf32>
    %5 = arith.addf %2, %4 : vector<2x128xf32>
    %cst_5 = arith.constant 0.000000e+00 : f32
    %6 = vector.broadcast %cst_5 : f32 to vector<2x128xf32>
    %7 = arith.maximumf %5, %6 : vector<2x128xf32>
    %c0_6 = arith.constant 0 : index
    %c0_7 = arith.constant 0 : index
    %8 = vector.load %arg4[%c0_6, %c0_7] : memref<2x128xf32, #tpu.memory_space<vmem>>, vector<2x128xf32>
    tpu.vector_store %arg4[%c0_6, %c0_7], %7 {strides = array<i32>} : memref<2x128xf32, #tpu.memory_space<vmem>>, vector<2x128xf32>,
    return
  }
  func.func @transform_0(%arg0: i32) -> (i32, i32) {
    %c0_i32 = arith.constant 0 : i32
    %c0_i32_0 = arith.constant 0 : i32
    %c0_i32_1 = arith.constant 0 : i32
    return %c0_i32, %c0_i32_0 : i32, i32
  }
  func.func @transform_1(%arg0: i32) -> (i32, i32) {
    %c0_i32 = arith.constant 0 : i32
    %c0_i32_0 = arith.constant 0 : i32
    return %c0_i32, %arg0 : i32, i32
  }
  func.func @transform_2(%arg0: i32) -> (i32, i32) {
    %c0_i32 = arith.constant 0 : i32
    %c0_i32_0 = arith.constant 0 : i32
    return %c0_i32, %arg0 : i32, i32
  }
  func.func @transform_3(%arg0: i32) -> (i32, i32) {
    %c0_i32 = arith.constant 0 : i32
    %c0_i32_0 = arith.constant 0 : i32
    return %c0_i32, %arg0 : i32, i32
  }
}

module attributes {stable_mosaic.version = 11 : i64} {
  func.func @_matmul_bias_kernel(%arg0: i32, %arg1: memref<2x120xbf16, #tpu.memory_space<vmem>>, %arg2: memref<120x128xbf16, #tpu.memory_space<vmem>>, %arg3: memref<1x128xf32, #tpu.memory_space<vmem>>, %arg4: memref<2x128xf32, #tpu.memory_space<vmem>>) attributes {dimension_semantics = [#tpu.dimension_semantics<parallel>], iteration_bounds = array<i64: 1>, scalar_prefetch = 0 : i64, scratch_operands = 0 : i64, tpu.core_type = #tpu.core_type<tc>, window_params = [{pipeline_mode = #tpu.pipeline_mode<synchronous>, transform_indices = @transform_0, window_bounds = array<i64: 2, 120>}, {transform_indices = @transform_1, window_bounds = array<i64: 120, 128>}, {transform_indices = @transform_2, window_bounds = array<i64: 1, 128>}, {transform_indices = @transform_3, window_bounds = array<i64: 2, 128>}]} {
    %c0 = arith.constant 0 : index
    %c0_0 = arith.constant 0 : index
    %0 = vector.load %arg1[%c0, %c0_0] : memref<2x120xbf16, #tpu.memory_space<vmem>>, vector<2x120xbf16>
    %c0_1 = arith.constant 0 : index
    %c0_2 = arith.constant 0 : index
    %1 = vector.load %arg2[%c0_1, %c0_2] : memref<120x128xbf16, #tpu.memory_space<vmem>>, vector<120x128xbf16>
    %cst = arith.constant dense<0.000000e+00> : vector<2x128xf32>
    %2 = tpu.matmul %0, %1, %cst {dimension_numbers = #tpu.dot_dimension_numbers<[1], [0], [0], [1], [0, 0, 1, 1], [], []>} : vector<2x120xbf16>, vector<120x128xbf16>, vector<2x128xf32> -> vector<2x128xf32>
    %c0_3 = arith.constant 0 : index
    %c0_4 = arith.constant 0 : index
    %3 = vector.load %arg3[%c0_3, %c0_4] : memref<1x128xf32, #tpu.memory_space<vmem>>, vector<1x128xf32>
    %4 = vector.broadcast %3 : vector<1x128xf32> to vector<2x128xf32>
    %5 = arith.addf %2, %4 : vector<2x128xf32>
    %cst_5 = arith.constant 0.000000e+00 : f32
    %6 = vector.broadcast %cst_5 : f32 to vector<2x128xf32>
    %7 = arith.maximumf %5, %6 : vector<2x128xf32>
    %c0_6 = arith.constant 0 : index
    %c0_7 = arith.constant 0 : index
    %8 = vector.load %arg4[%c0_6, %c0_7] : memref<2x128xf32, #tpu.memory_space<vmem>>, vector<2x128xf32>
    tpu.vector_store %arg4[%c0_6, %c0_7], %7 {strides = array<i32>} : memref<2x128xf32, #tpu.memory_space<vmem>>, vector<2x128xf32>,
    return
  }
  func.func @transform_0(%arg0: i32) -> (i32, i32) {
    %c0_i32 = arith.constant 0 : i32
    %c0_i32_0 = arith.constant 0 : i32
    %c0_i32_1 = arith.constant 0 : i32
    return %c0_i32, %c0_i32_0 : i32, i32
  }
  func.func @transform_1(%arg0: i32) -> (i32, i32) {
    %c0_i32 = arith.constant 0 : i32
    %c0_i32_0 = arith.constant 0 : i32
    return %c0_i32, %arg0 : i32, i32
  }
  func.func @transform_2(%arg0: i32) -> (i32, i32) {
    %c0_i32 = arith.constant 0 : i32
    %c0_i32_0 = arith.constant 0 : i32
    return %c0_i32, %arg0 : i32, i32
  }
  func.func @transform_3(%arg0: i32) -> (i32, i32) {
    %c0_i32 = arith.constant 0 : i32
    %c0_i32_0 = arith.constant 0 : i32
    return %c0_i32, %arg0 : i32, i32
  }
}

module attributes {stable_mosaic.version = 11 : i64} {
  func.func @_matmul_bias_kernel(%arg0: i32, %arg1: memref<2x84xbf16, #tpu.memory_space<vmem>>, %arg2: memref<84x128xbf16, #tpu.memory_space<vmem>>, %arg3: memref<1x128xf32, #tpu.memory_space<vmem>>, %arg4: memref<2x128xf32, #tpu.memory_space<vmem>>) attributes {dimension_semantics = [#tpu.dimension_semantics<parallel>], iteration_bounds = array<i64: 1>, scalar_prefetch = 0 : i64, scratch_operands = 0 : i64, tpu.core_type = #tpu.core_type<tc>, window_params = [{pipeline_mode = #tpu.pipeline_mode<synchronous>, transform_indices = @transform_0, window_bounds = array<i64: 2, 84>}, {transform_indices = @transform_1, window_bounds = array<i64: 84, 128>}, {transform_indices = @transform_2, window_bounds = array<i64: 1, 128>}, {transform_indices = @transform_3, window_bounds = array<i64: 2, 128>}]} {
    %c0 = arith.constant 0 : index
    %c0_0 = arith.constant 0 : index
    %0 = vector.load %arg1[%c0, %c0_0] : memref<2x84xbf16, #tpu.memory_space<vmem>>, vector<2x84xbf16>
    %c0_1 = arith.constant 0 : index
    %c0_2 = arith.constant 0 : index
    %1 = vector.load %arg2[%c0_1, %c0_2] : memref<84x128xbf16, #tpu.memory_space<vmem>>, vector<84x128xbf16>
    %cst = arith.constant dense<0.000000e+00> : vector<2x128xf32>
    %2 = tpu.matmul %0, %1, %cst {dimension_numbers = #tpu.dot_dimension_numbers<[1], [0], [0], [1], [0, 0, 1, 1], [], []>} : vector<2x84xbf16>, vector<84x128xbf16>, vector<2x128xf32> -> vector<2x128xf32>
    %c0_3 = arith.constant 0 : index
    %c0_4 = arith.constant 0 : index
    %3 = vector.load %arg3[%c0_3, %c0_4] : memref<1x128xf32, #tpu.memory_space<vmem>>, vector<1x128xf32>
    %4 = vector.broadcast %3 : vector<1x128xf32> to vector<2x128xf32>
    %5 = arith.addf %2, %4 : vector<2x128xf32>
    %c0_5 = arith.constant 0 : index
    %c0_6 = arith.constant 0 : index
    %6 = vector.load %arg4[%c0_5, %c0_6] : memref<2x128xf32, #tpu.memory_space<vmem>>, vector<2x128xf32>
    tpu.vector_store %arg4[%c0_5, %c0_6], %5 {strides = array<i32>} : memref<2x128xf32, #tpu.memory_space<vmem>>, vector<2x128xf32>,
    return
  }
  func.func @transform_0(%arg0: i32) -> (i32, i32) {
    %c0_i32 = arith.constant 0 : i32
    %c0_i32_0 = arith.constant 0 : i32
    %c0_i32_1 = arith.constant 0 : i32
    return %c0_i32, %c0_i32_0 : i32, i32
  }
  func.func @transform_1(%arg0: i32) -> (i32, i32) {
    %c0_i32 = arith.constant 0 : i32
    %c0_i32_0 = arith.constant 0 : i32
    return %c0_i32, %arg0 : i32, i32
  }
  func.func @transform_2(%arg0: i32) -> (i32, i32) {
    %c0_i32 = arith.constant 0 : i32
    %c0_i32_0 = arith.constant 0 : i32
    return %c0_i32, %arg0 : i32, i32
  }
  func.func @transform_3(%arg0: i32) -> (i32, i32) {
    %c0_i32 = arith.constant 0 : i32
    %c0_i32_0 = arith.constant 0 : i32
    return %c0_i32, %arg0 : i32, i32
  }
}

</mosaic_0001>

<bundles_post_ra>
// kernel: net_forward.10
= control target key start
LH: loop header
LB: loop body
LE: loop exit
PB: predicated region body
PF: predicated region fallthrough
CT: control target
= control target key end

     0   :  { %s267_s10 = smov 100   ;;  %s268_s21 = smov 127   ;;  %vm239_vm0 = vcmask 220160   ;;  %s560_s0 = inlined_call_operand.vmem [shape: f32[168,56], index: 0, kind: input, shape index: {}]   ;;  %s561_s1 = inlined_call_operand.vmem [shape: f32[168,27], index: 1, kind: output, shape index: {}]  }
   0x1   :  { %v8_v0 = vld [vmem:[%s560_s0] sm:$0xff]  ;;  %v10_v1 = vld [vmem:[%s560_s0 + $0x10] sm:$0xff]  ;;  %v9_v2 = vld [vmem:[%s560_s0 + $0x8] sm:$0xff] }
   0x2   :  { %50 = vrot.lane.b32.xlu0 %v8_v0, %s267_s10  ;;  %54 = vrot.lane.b32.xlu1 %v10_v1, %s267_s10  ;;  %v11_v3 = vld [vmem:[%s560_s0 + $0x18] sm:$0xff]  ;;  %v12_v4 = vld [vmem:[%s560_s0 + $0x20] sm:$0xff] }
   0x3   :  { %v13_v5 = vld [vmem:[%s560_s0 + $0x28] sm:$0xff]  ;;  %v14_v6 = vld [vmem:[%s560_s0 + $0x30] sm:$0xff]  ;;  %v15_v7 = vld [vmem:[%s560_s0 + $0x38] sm:$0xff] }
   0x4   :  { %v16_v8 = vld [vmem:[%s560_s0 + $0x40] sm:$0xff]  ;;  %v17_v9 = vld [vmem:[%s560_s0 + $0x48] sm:$0xff]  ;;  %v18_v10 = vld [vmem:[%s560_s0 + $0x50] sm:$0xff] }
   0x5   :  { %v19_v11 = vld [vmem:[%s560_s0 + $0x58] sm:$0xff]  ;;  %v20_v12 = vld [vmem:[%s560_s0 + $0x60] sm:$0xff]  ;;  %v21_v13 = vld [vmem:[%s560_s0 + $0x68] sm:$0xff] }
   0x6   :  { %52 = vrot.lane.b32.xlu0 %v9_v2, %s267_s10  ;;  %56 = vrot.lane.b32.xlu1 %v11_v3, %s267_s10  ;;  %v22_v14 = vld [vmem:[%s560_s0 + $0x70] sm:$0xff]  ;;  %v23_v15 = vld [vmem:[%s560_s0 + $0x78] sm:$0xff] }
   0x7   :  { %v24_v16 = vld [vmem:[%s560_s0 + $0x80] sm:$0xff]  ;;  %v25_v17 = vld [vmem:[%s560_s0 + $0x88] sm:$0xff]  ;;  %v26_v18 = vld [vmem:[%s560_s0 + $0x90] sm:$0xff] }
   0x8   :  { %v357_v19 = vld [vmem:[%s560_s0 + $0x98] sm:$0xff]  ;;  %v365_v20 = vld [vmem:[%s560_s0 + $0xa0] sm:$0xff] }
   0xa   :  { %58 = vrot.lane.b32.xlu0 %v12_v4, %s267_s10  ;;  %60 = vrot.lane.b32.xlu1 %v13_v5, %s267_s10 }
   0xe   :  { %62 = vrot.lane.b32.xlu0 %v14_v6, %s267_s10  ;;  %64 = vrot.lane.b32.xlu1 %v15_v7, %s267_s10 }
  0x12   :  { %66 = vrot.lane.b32.xlu0 %v16_v8, %s267_s10  ;;  %68 = vrot.lane.b32.xlu1 %v17_v9, %s267_s10 }
  0x16   :  { %70 = vrot.lane.b32.xlu0 %v18_v10, %s267_s10  ;;  %72 = vrot.lane.b32.xlu1 %v19_v11, %s267_s10 }
  0x1a   :  { %74 = vrot.lane.b32.xlu0 %v20_v12, %s267_s10  ;;  %76 = vrot.lane.b32.xlu1 %v21_v13, %s267_s10 }
  0x1e   :  { %78 = vrot.lane.b32.xlu0 %v22_v14, %s267_s10  ;;  %80 = vrot.lane.b32.xlu1 %v23_v15, %s267_s10 }
  0x22   :  { %82 = vrot.lane.b32.xlu0 %v24_v16, %s267_s10  ;;  %84 = vrot.lane.b32.xlu1 %v25_v17, %s267_s10 }
  0x26   :  { %86 = vrot.lane.b32.xlu0 %v26_v18, %s267_s10  ;;  %88 = vrot.lane.b32.xlu1 %v357_v19, %s267_s10 }
  0x2a   :  { %90 = vrot.lane.b32.xlu0 %v365_v20, %s267_s10 }
  0x74   :  { %v51_v21 = vpop.permute.xlu0 %50  ;;  %v55_v22 = vpop.permute.xlu1 %54 }
  0x75   :  { %v369_v23 = vmax.f32 %v8_v0, %v51_v21  ;;  %v373_v24 = vmax.f32 %v10_v1, %v55_v22 }
  0x77   :  { %155 = vrot.lane.b32.xlu1 %v369_v23, %s268_s21 }
  0x78   :  { %v53_v25 = vpop.permute.xlu0 %52  ;;  %v57_v26 = vpop.permute.xlu1 %56 }
  0x79   :  { %v375_v27 = vmax.f32 %v9_v2, %v53_v25  ;;  %v381_v28 = vmax.f32 %v11_v3, %v57_v26 }
  0x7b   :  { %159 = vrot.lane.b32.xlu1 %v373_v24, %s268_s21  ;;  %157 = vrot.lane.b32.xlu0 %v375_v27, %s268_s21 }
  0x7c   :  { %v59_v29 = vpop.permute.xlu0 %58  ;;  %v61_v30 = vpop.permute.xlu1 %60 }
  0x7d   :  { %v383_v31 = vmax.f32 %v12_v4, %v59_v29  ;;  %v389_v32 = vmax.f32 %v13_v5, %v61_v30 }
  0x7f   :  { %161 = vrot.lane.b32.xlu0 %v381_v28, %s268_s21  ;;  %163 = vrot.lane.b32.xlu1 %v383_v31, %s268_s21 }
  0x80   :  { %v63_v33 = vpop.permute.xlu0 %62  ;;  %v65_v34 = vpop.permute.xlu1 %64 }
  0x81   :  { %v391_v35 = vmax.f32 %v14_v6, %v63_v33  ;;  %v397_v36 = vmax.f32 %v15_v7, %v65_v34 }
  0x83   :  { %165 = vrot.lane.b32.xlu0 %v389_v32, %s268_s21  ;;  %167 = vrot.lane.b32.xlu1 %v391_v35, %s268_s21 }
  0x84   :  { %v67_v37 = vpop.permute.xlu0 %66  ;;  %v69_v38 = vpop.permute.xlu1 %68 }
  0x85   :  { %v399_v39 = vmax.f32 %v16_v8, %v67_v37  ;;  %v405_v40 = vmax.f32 %v17_v9, %v69_v38 }
  0x87   :  { %169 = vrot.lane.b32.xlu0 %v397_v36, %s268_s21  ;;  %171 = vrot.lane.b32.xlu1 %v399_v39, %s268_s21 }
  0x88   :  { %v71_v41 = vpop.permute.xlu0 %70  ;;  %v73_v42 = vpop.permute.xlu1 %72 }
  0x89   :  { %v407_v43 = vmax.f32 %v18_v10, %v71_v41  ;;  %v413_v44 = vmax.f32 %v19_v11, %v73_v42 }
  0x8b   :  { %173 = vrot.lane.b32.xlu0 %v405_v40, %s268_s21  ;;  %175 = vrot.lane.b32.xlu1 %v407_v43, %s268_s21 }
  0x8c   :  { %v75_v45 = vpop.permute.xlu0 %74  ;;  %v77_v46 = vpop.permute.xlu1 %76 }
  0x8d   :  { %v415_v47 = vmax.f32 %v20_v12, %v75_v45  ;;  %v421_v48 = vmax.f32 %v21_v13, %v77_v46 }
  0x8f   :  { %177 = vrot.lane.b32.xlu0 %v413_v44, %s268_s21  ;;  %179 = vrot.lane.b32.xlu1 %v415_v47, %s268_s21 }
  0x90   :  { %v79_v49 = vpop.permute.xlu0 %78  ;;  %v81_v50 = vpop.permute.xlu1 %80 }
  0x91   :  { %v423_v51 = vmax.f32 %v22_v14, %v79_v49  ;;  %v429_v52 = vmax.f32 %v23_v15, %v81_v50 }
  0x93   :  { %181 = vrot.lane.b32.xlu0 %v421_v48, %s268_s21  ;;  %183 = vrot.lane.b32.xlu1 %v423_v51, %s268_s21 }
  0x94   :  { %v83_v53 = vpop.permute.xlu0 %82  ;;  %v85_v54 = vpop.permute.xlu1 %84 }
  0x95   :  { %v431_v55 = vmax.f32 %v24_v16, %v83_v53  ;;  %v437_v56 = vmax.f32 %v25_v17, %v85_v54 }
  0x97   :  { %185 = vrot.lane.b32.xlu0 %v429_v52, %s268_s21  ;;  %187 = vrot.lane.b32.xlu1 %v431_v55, %s268_s21 }
  0x98   :  { %v87_v57 = vpop.permute.xlu0 %86  ;;  %v89_v58 = vpop.permute.xlu1 %88 }
  0x99   :  { %v439_v59 = vmax.f32 %v26_v18, %v87_v57  ;;  %v446_v60 = vmax.f32 %v357_v19, %v89_v58 }
  0x9b   :  { %189 = vrot.lane.b32.xlu0 %v437_v56, %s268_s21  ;;  %191 = vrot.lane.b32.xlu1 %v439_v59, %s268_s21 }
  0x9c   :  { %v91_v61 = vpop.permute.xlu0 %90 }
  0x9d   :  { %v449_v62 = vmax.f32 %v365_v20, %v91_v61 }
  0x9f   :  { %193 = vrot.lane.b32.xlu0 %v446_v60, %s268_s21  ;;  %195 = vrot.lane.b32.xlu1 %v449_v62, %s268_s21 }
  0xe9   :  { %v156_v63 = vpop.permute.xlu1 %155 }
  0xea   :  { %v218_v0 = vmax.f32 %v369_v23, %v156_v63 }
  0xec   :  { %240 = vst.msk [vmem:[%s561_s1] sm:$0xff] %vm239_vm0, %v218_v0 }
  0xed   :  { %v160_v1 = vpop.permute.xlu1 %159  ;;  %v158_v2 = vpop.permute.xlu0 %157 }
  0xee   :  { %v220_v3 = vmax.f32 %v373_v24, %v160_v1  ;;  %v219_v4 = vmax.f32 %v375_v27, %v158_v2 }
  0xf0   :  { %242 = vst.msk [vmem:[%s561_s1 + $0x10] sm:$0xff] %vm239_vm0, %v220_v3  ;;  %241 = vst.msk [vmem:[%s561_s1 + $0x8] sm:$0xff] %vm239_vm0, %v219_v4 }
  0xf1   :  { %v164_v5 = vpop.permute.xlu1 %163  ;;  %v162_v6 = vpop.permute.xlu0 %161 }
  0xf2   :  { %v222_v7 = vmax.f32 %v383_v31, %v164_v5  ;;  %v221_v8 = vmax.f32 %v381_v28, %v162_v6 }
  0xf4   :  { %244 = vst.msk [vmem:[%s561_s1 + $0x20] sm:$0xff] %vm239_vm0, %v222_v7  ;;  %243 = vst.msk [vmem:[%s561_s1 + $0x18] sm:$0xff] %vm239_vm0, %v221_v8 }
  0xf5   :  { %v168_v9 = vpop.permute.xlu1 %167  ;;  %v166_v10 = vpop.permute.xlu0 %165 }
  0xf6   :  { %v224_v11 = vmax.f32 %v391_v35, %v168_v9  ;;  %v223_v12 = vmax.f32 %v389_v32, %v166_v10 }
  0xf8   :  { %246 = vst.msk [vmem:[%s561_s1 + $0x30] sm:$0xff] %vm239_vm0, %v224_v11  ;;  %245 = vst.msk [vmem:[%s561_s1 + $0x28] sm:$0xff] %vm239_vm0, %v223_v12 }
  0xf9   :  { %v172_v13 = vpop.permute.xlu1 %171  ;;  %v170_v14 = vpop.permute.xlu0 %169 }
  0xfa   :  { %v226_v15 = vmax.f32 %v399_v39, %v172_v13  ;;  %v225_v16 = vmax.f32 %v397_v36, %v170_v14 }
  0xfc   :  { %248 = vst.msk [vmem:[%s561_s1 + $0x40] sm:$0xff] %vm239_vm0, %v226_v15  ;;  %247 = vst.msk [vmem:[%s561_s1 + $0x38] sm:$0xff] %vm239_vm0, %v225_v16 }
  0xfd   :  { %v176_v17 = vpop.permute.xlu1 %175  ;;  %v174_v18 = vpop.permute.xlu0 %173 }
  0xfe   :  { %v228_v19 = vmax.f32 %v407_v43, %v176_v17  ;;  %v227_v20 = vmax.f32 %v405_v40, %v174_v18 }
 0x100   :  { %250 = vst.msk [vmem:[%s561_s1 + $0x50] sm:$0xff] %vm239_vm0, %v228_v19  ;;  %249 = vst.msk [vmem:[%s561_s1 + $0x48] sm:$0xff] %vm239_vm0, %v227_v20 }
 0x101   :  { %v180_v21 = vpop.permute.xlu1 %179  ;;  %v178_v22 = vpop.permute.xlu0 %177 }
 0x102   :  { %v230_v23 = vmax.f32 %v415_v47, %v180_v21  ;;  %v229_v24 = vmax.f32 %v413_v44, %v178_v22 }
 0x104   :  { %252 = vst.msk [vmem:[%s561_s1 + $0x60] sm:$0xff] %vm239_vm0, %v230_v23  ;;  %251 = vst.msk [vmem:[%s561_s1 + $0x58] sm:$0xff] %vm239_vm0, %v229_v24 }
 0x105   :  { %v184_v25 = vpop.permute.xlu1 %183  ;;  %v182_v26 = vpop.permute.xlu0 %181 }
 0x106   :  { %v232_v27 = vmax.f32 %v423_v51, %v184_v25  ;;  %v231_v28 = vmax.f32 %v421_v48, %v182_v26 }
 0x108   :  { %254 = vst.msk [vmem:[%s561_s1 + $0x70] sm:$0xff] %vm239_vm0, %v232_v27  ;;  %253 = vst.msk [vmem:[%s561_s1 + $0x68] sm:$0xff] %vm239_vm0, %v231_v28 }
 0x109   :  { %v188_v29 = vpop.permute.xlu1 %187  ;;  %v186_v30 = vpop.permute.xlu0 %185 }
 0x10a   :  { %v234_v31 = vmax.f32 %v431_v55, %v188_v29  ;;  %v233_v32 = vmax.f32 %v429_v52, %v186_v30 }
 0x10c   :  { %256 = vst.msk [vmem:[%s561_s1 + $0x80] sm:$0xff] %vm239_vm0, %v234_v31  ;;  %255 = vst.msk [vmem:[%s561_s1 + $0x78] sm:$0xff] %vm239_vm0, %v233_v32 }
 0x10d   :  { %v192_v33 = vpop.permute.xlu1 %191  ;;  %v190_v34 = vpop.permute.xlu0 %189 }
 0x10e   :  { %v236_v35 = vmax.f32 %v439_v59, %v192_v33  ;;  %v235_v36 = vmax.f32 %v437_v56, %v190_v34 }
 0x110   :  { %258 = vst.msk [vmem:[%s561_s1 + $0x90] sm:$0xff] %vm239_vm0, %v236_v35  ;;  %257 = vst.msk [vmem:[%s561_s1 + $0x88] sm:$0xff] %vm239_vm0, %v235_v36 }
 0x111   :  { %v196_v37 = vpop.permute.xlu1 %195  ;;  %v194_v38 = vpop.permute.xlu0 %193 }
 0x112   :  { %v238_v39 = vmax.f32 %v449_v62, %v196_v37  ;;  %v237_v40 = vmax.f32 %v446_v60, %v194_v38 }
 0x114   :  { %260 = vst.msk [vmem:[%s561_s1 + $0xa0] sm:$0xff] %vm239_vm0, %v238_v39  ;;  %259 = vst.msk [vmem:[%s561_s1 + $0x98] sm:$0xff] %vm239_vm0, %v237_v40 }

// kernel: net_forward.9
= control target key start
LH: loop header
LB: loop body
LE: loop exit
PB: predicated region body
PF: predicated region fallthrough
CT: control target
= control target key end

     0   :  { %s666_s12 = smov 0   ;;  %s668_s13 = smov 0   ;;  %s790_s0 = inlined_call_operand.vmem [shape: bf16[6,75], index: 0, kind: input, shape index: {}]   ;;  %s791_s1 = inlined_call_operand.vmem [shape: bf16[75,2048], index: 1, kind: input, shape index: {}]   ;;  %s792_s2 = inlined_call_operand.vmem [shape: f32[6,1], index: 2, kind: input, shape index: {}]   ;;  %s793_s3 = inlined_call_operand.vmem [shape: f32[6,2048], index: 3, kind: output, shape index: {}]  }
   0x1   :  { %s670_s14 = smov 0  }
   0x2 LB: > { %s527_s15 = sadd.s32 4294967295, %s642_s14   ;;  %s683_s16 = sadd.s32 1, %s642_s14   ;;  %s642_s14 = sphi %s670_s14, %s796_s14   ;;  %s638_s13 = sphi %s668_s13, %s795_s13   ;;  %s634_s12 = sphi %s666_s12, %s794_s12  }
   0x3   : > { %s38_s17 = ssub.s32 %s642_s14, %s683_s16  ;;  %s41_s18 = sadd.s32 1, %s638_s13 }
   0x4   : > { %p39_p0 = scmp.eq.s32.totalorder %s38_s17, 0  ;;  %p48_p1 = scmp.ne.s32.totalorder %s638_s13, %s634_s12 }
   0x5   : > { %p49_p2 = scmp.eq.s32.totalorder %s642_s14, 0  ;;  %p530_p4 = scmp.ge.s32.totalorder %s642_s14, 4 }
   0x6   : > { %s692_s19 = scalar_select %p39_p0, %s638_s13, %s41_s18  }
   0x7   : > { %p50_p3 = por %p49_p2, %p48_p1  ;;  %127 = sbr.rel (%p530_p4) target bundleno = 28 (0x1c), region = 24 }
   0xe   : > { %130 = sbr.rel (!%p50_p3) target bundleno = 28 (0x1c), region = 28  ;;  %s132_s20 = sand.u32 (%p50_p3), 1, %s638_s13  }
   0xf   : > { %s560_s21 = sshll.u32 (%p50_p3), %s642_s14, 4  ;;  %s561_s22 = smul.u32 (%p50_p3), 160, %s132_s20 }
  0x10   : > { %s700_s25 = scalar_lea.vmem (%p50_p3), %s791_s1, %s560_s21 }
  0x11   : > { %v150_v0 = vld [vmem:[%s700_s25] sm:$0xff] (%p50_p3)  ;;  %v152_v1 = vld [vmem:[%s700_s25 + $0x8] sm:$0xff] (%p50_p3)  ;;  %s708_s26 = scalar_lea.vmem (%p50_p3), [#allocation2], %s561_s22 }
  0x12   : > { %v154_v2 = vld [vmem:[%s700_s25 + $0x40] sm:$0xff] (%p50_p3)  ;;  %v156_v3 = vld [vmem:[%s700_s25 + $0x48] sm:$0xff] (%p50_p3)  ;;  %151 = vst [vmem:[%s708_s26] sm:$0xff] (%p50_p3), %v150_v0  ;;  %153 = vst [vmem:[%s708_s26 + $0x8] sm:$0xff] (%p50_p3), %v152_v1 }
  0x13   : > { %v158_v4 = vld [vmem:[%s700_s25 + $0x80] sm:$0xff] (%p50_p3)  ;;  %v160_v5 = vld [vmem:[%s700_s25 + $0x88] sm:$0xff] (%p50_p3)  ;;  %155 = vst [vmem:[%s708_s26 + $0x10] sm:$0xff] (%p50_p3), %v154_v2  ;;  %157 = vst [vmem:[%s708_s26 + $0x18] sm:$0xff] (%p50_p3), %v156_v3 }
  0x14   : > { %159 = vst [vmem:[%s708_s26 + $0x20] sm:$0xff] (%p50_p3), %v158_v4  ;;  %161 = vst [vmem:[%s708_s26 + $0x28] sm:$0xff] (%p50_p3), %v160_v5  ;;  %v162_v6 = vld [vmem:[%s700_s25 + $0xc0] sm:$0xff] (%p50_p3)  ;;  %v164_v7 = vld [vmem:[%s700_s25 + $0xc8] sm:$0xff] (%p50_p3) }
  0x15   : > { %v166_v8 = vld [vmem:[%s700_s25 + $0x100] sm:$0xff]  ;;  %163 = vst [vmem:[%s708_s26 + $0x30] sm:$0xff] %v162_v6  ;;  %165 = vst [vmem:[%s708_s26 + $0x38] sm:$0xff] %v164_v7  ;;  %v168_v9 = vld [vmem:[%s700_s25 + $0x108] sm:$0xff] }
  0x16   : > { %167 = vst [vmem:[%s708_s26 + $0x40] sm:$0xff] %v166_v8  ;;  %v170_v10 = vld [vmem:[%s700_s25 + $0x140] sm:$0xff]  ;;  %v172_v11 = vld [vmem:[%s700_s25 + $0x148] sm:$0xff]  ;;  %169 = vst [vmem:[%s708_s26 + $0x48] sm:$0xff] %v168_v9 }
  0x17   : > { %171 = vst [vmem:[%s708_s26 + $0x50] sm:$0xff] %v170_v10  ;;  %173 = vst [vmem:[%s708_s26 + $0x58] sm:$0xff] %v172_v11  ;;  %v174_v12 = vld [vmem:[%s700_s25 + $0x180] sm:$0xff]  ;;  %v176_v13 = vld [vmem:[%s700_s25 + $0x188] sm:$0xff] }
  0x18   : > { %v178_v14 = vld [vmem:[%s700_s25 + $0x1c0] sm:$0xff]  ;;  %175 = vst [vmem:[%s708_s26 + $0x60] sm:$0xff] %v174_v12  ;;  %177 = vst [vmem:[%s708_s26 + $0x68] sm:$0xff] %v176_v13  ;;  %v180_v15 = vld [vmem:[%s700_s25 + $0x1c8] sm:$0xff] }
  0x19   : > { %179 = vst [vmem:[%s708_s26 + $0x70] sm:$0xff] %v178_v14  ;;  %v182_v16 = vld [vmem:[%s700_s25 + $0x200] sm:$0xff]  ;;  %v184_v17 = vld [vmem:[%s700_s25 + $0x208] sm:$0xff]  ;;  %181 = vst [vmem:[%s708_s26 + $0x78] sm:$0xff] %v180_v15 }
  0x1a   : > { %183 = vst [vmem:[%s708_s26 + $0x80] sm:$0xff] %v182_v16  ;;  %185 = vst [vmem:[%s708_s26 + $0x88] sm:$0xff] %v184_v17  ;;  %v186_v18 = vld [vmem:[%s700_s25 + $0x240] sm:$0xff]  ;;  %v188_v19 = vld [vmem:[%s700_s25 + $0x248] sm:$0xff] }
  0x1b   : > { %187 = vst [vmem:[%s708_s26 + $0x90] sm:$0xff] %v186_v18  ;;  %189 = vst [vmem:[%s708_s26 + $0x98] sm:$0xff] %v188_v19 }
  0x1c PF: > { %p533_p5 = scmp.ge.s32.totalorder %s642_s14, 1  ;;  %p194_p6 = scmp.lt.s32.totalorder %s642_s14, 5 }
  0x1e   : > { %p195_p7 = pnand %p533_p5, %p194_p6 }
  0x1f   : > { %s201_s27 = sand.u32 (!%p195_p7), 1, %s634_s12   ;;  %v644_v20 = vmov (!%p195_p7), 0   ;;  %v253_v21 = vld [vmem:[%s792_s2] sm:$0x3f] (!%p195_p7)  ;;  %vm359_vm0 = vcmask (!%p195_p7), 1044480   ;;  %vm360_vm1 = vcmask (!%p195_p7), 1045504  }
  0x20   : > { %198 = sbr.rel (%p195_p7) target bundleno = 275 (0x113), region = 51  ;;  %407 = vmatprep.mubr.bf16.mxu0 (!%p195_p7), %v644_v20  ;;  %448 = vmatprep.mubr.bf16.mxu1 (!%p195_p7), %v644_v20  ;;  %v645_v31 = vmov (!%p195_p7), 65535   ;;  %v232_v49 = vld [vmem:[%s790_s0] sm:$0x7] (!%p195_p7)  ;;  %vm355_vm2 = vcmask (!%p195_p7), 613376   ;;  %s534_s7 = sshll.u32 (!%p195_p7), %s527_s15, 2 }
  0x21   : > { %s562_s28 = smul.u32 (!%p195_p7), 160, %s201_s27  ;;  %589 = vset.pattern.permute.xlu0 (!%p195_p7), %v644_v20  ;;  %v361_v32 = vsel (!%p195_p7), %vm359_vm0, 4294967295, %v645_v31  ;;  %p226_p8 = scmp.lt.s32.totalorder (!%p195_p7), %s534_s7, 15 }
  0x22   : > { %256 = vperm.xlu0 (!%p195_p7), %589, %v253_v21   ;;  %v362_v40 = vsel (!%p195_p7), %vm360_vm1, %v361_v32, 0 }
  0x23   : > { %s750_s4 = scalar_lea.vmem (!%p195_p7), [#allocation2], %s562_s28 }
  0x24   : > { %v590_v22 = vld [vmem:[%s750_s4 + $0x4] ss:$16 sps:$4 sm:$0xff] (!%p195_p7)   ;;  %v592_v23 = vld [vmem:[%s750_s4 + $0xc] ss:$16 sps:$4 sm:$0xff] (!%p195_p7)   ;;  %v594_v24 = vld [vmem:[%s750_s4] ss:$16 sps:$4 sm:$0xff] (!%p195_p7)  }
  0x25   : > { %375 = vmatprep.subr.bf16.mxu0 (!%p195_p7), %v590_v22  ;;  %v595_v25 = vld [vmem:[%s750_s4 + $0x8] ss:$16 sps:$4 sm:$0xff] (!%p195_p7)   ;;  %416 = vmatprep.subr.bf16.mxu1 (!%p195_p7), %v592_v23  ;;  %v596_v26 = vld [vmem:[%s750_s4 + $0x24] ss:$16 sps:$4 sm:$0xff] (!%p195_p7)   ;;  %v598_v27 = vld [vmem:[%s750_s4 + $0x2c] ss:$16 sps:$4 sm:$0xff] (!%p195_p7)  }
  0x26   : > { %376 = vmatpush1.bf16.msra.mxu0 (!%p195_p7), %v594_v24  ;;  %417 = vmatpush1.bf16.msra.mxu1 (!%p195_p7), %v595_v25  ;;  %v600_v28 = vld [vmem:[%s750_s4 + $0x20] ss:$16 sps:$4 sm:$0xff] (!%p195_p7)   ;;  %v601_v29 = vld [vmem:[%s750_s4 + $0x28] ss:$16 sps:$4 sm:$0xff] (!%p195_p7)   ;;  %v602_v30 = vld [vmem:[%s750_s4 + $0x44] ss:$16 sps:$4 sm:$0xff] (!%p195_p7)  }
  0x27   : > { %377 = vmatprep.subr.bf16.mxu0 %v596_v26  ;;  %418 = vmatprep.subr.bf16.mxu1 %v598_v27  ;;  %v604_v33 = vld [vmem:[%s750_s4 + $0x4c] ss:$16 sps:$4 sm:$0xff]   ;;  %v606_v34 = vld [vmem:[%s750_s4 + $0x40] ss:$16 sps:$4 sm:$0xff]   ;;  %v607_v35 = vld [vmem:[%s750_s4 + $0x48] ss:$16 sps:$4 sm:$0xff]  }
  0x28   : > { %v608_v36 = vld [vmem:[%s750_s4 + $0x64] ss:$16 sps:$4 sm:$0xff]   ;;  %v610_v37 = vld [vmem:[%s750_s4 + $0x6c] ss:$16 sps:$4 sm:$0xff]   ;;  %v612_v38 = vld [vmem:[%s750_s4 + $0x60] ss:$16 sps:$4 sm:$0xff]  }
  0x29   : > { %v613_v39 = vld [vmem:[%s750_s4 + $0x68] ss:$16 sps:$4 sm:$0xff]   ;;  %v614_v41 = vld [vmem:[%s750_s4 + $0x84] ss:$16 sps:$4 sm:$0x3f]   ;;  %s798_s7 = smov (!%p226_p8, %s534_s7), 15 }
  0x2a   : > { %378 = vmatpush1.bf16.msra.mxu0 %v600_v28  ;;  %419 = vmatpush1.bf16.msra.mxu1 %v601_v29  ;;  %v616_v42 = vld [vmem:[%s750_s4 + $0x8c] ss:$16 sps:$4 sm:$0x3f]   ;;  %v367_v43 = vand.u32 %v614_v41, %v362_v40  ;;  %v618_v44 = vld [vmem:[%s750_s4 + $0x80] ss:$16 sps:$4 sm:$0x3f]  }
  0x2b   : > { %379 = vmatprep.subr.bf16.mxu0 %v602_v30  ;;  %420 = vmatprep.subr.bf16.mxu1 %v604_v33  ;;  %v619_v45 = vld [vmem:[%s750_s4 + $0x88] ss:$16 sps:$4 sm:$0x3f]   ;;  %v373_v46 = vand.u32 %v616_v42, %v362_v40  ;;  %v364_v47 = vand.u32 %v618_v44, %v362_v40  ;;  %s535_s8 = sshll.u32 %s798_s7, 3 }
  0x2c   : > { %v370_v48 = vand.u32 %v619_v45, %v362_v40  ;;  %s229_s11 = scalar_lea.vmem %s793_s3, %s535_s8 }
  0x2e   : > { %380 = vmatpush1.bf16.msra.mxu0 %v606_v34  ;;  %421 = vmatpush1.bf16.msra.mxu1 %v607_v35 }
  0x2f   : > { %381 = vmatprep.subr.bf16.mxu0 %v608_v36  ;;  %422 = vmatprep.subr.bf16.mxu1 %v610_v37 }
  0x32   : > { %382 = vmatpush1.bf16.msra.mxu0 %v612_v38  ;;  %423 = vmatpush1.bf16.msra.mxu1 %v613_v39 }
  0x33   : > { %383 = vmatprep.subr.bf16.mxu0 %v367_v43  ;;  %424 = vmatprep.subr.bf16.mxu1 %v373_v46 }
  0x36   : > { %384 = vmatpush1.bf16.msra.mxu0 %v364_v47  ;;  %425 = vmatpush1.bf16.msra.mxu1 %v370_v48 }
  0x39   : > { %556 = vmatmul.mubr.msk.bf16.vlgmr.msra.gmra.mrb[0].mxu0 %vm355_vm2, %v232_v49  ;;  %557 = vmatmul.mubr.msk.bf16.vlgmr.msra.gmra.mrb[0].mxu1 %vm355_vm2, %v232_v49 }
  0xa1   : > { %v257_v50 = vpop.permute.xlu0 %256 }
 0x10c   : > { %v409_v51 = vpop.f32.mrb[0].mxu0  ;;  %v450_v52 = vpop.f32.mrb[0].mxu1 }
 0x10d   : > { %v410_v53 = vadd.f32 %v409_v51, %v257_v50  ;;  %v451_v54 = vadd.f32 %v450_v52, %v257_v50  ;;  %v411_v55 = vpop.f32.mrb[1].mxu0  ;;  %v452_v56 = vpop.f32.mrb[1].mxu1 }
 0x10e   : > { %v412_v57 = vadd.f32 %v411_v55, %v257_v50  ;;  %v453_v58 = vadd.f32 %v452_v56, %v257_v50  ;;  %v413_v59 = vpop.f32.mrb[2].mxu0  ;;  %v454_v60 = vpop.f32.mrb[2].mxu1 }
 0x10f   : > { %v457_v61 = vmax.f32 %v410_v53, 0.0  ;;  %v459_v62 = vmax.f32 %v451_v54, 0.0  ;;  %v414_v63 = vpop.f32.mrb[3].mxu0  ;;  %v455_v0 = vpop.f32.mrb[3].mxu1 }
 0x110   : > { %v458_v1 = vmax.f32 %v412_v57, 0.0  ;;  %v460_v2 = vmax.f32 %v453_v58, 0.0 }
 0x111   : > { %461 = vst [vmem:[%s229_s11] sm:$0x3f] %v457_v61  ;;  %463 = vst [vmem:[%s229_s11 + $0x10] sm:$0x3f] %v459_v62 }
 0x112   : > { %462 = vst [vmem:[%s229_s11 + $0x8] sm:$0x3f] %v458_v1  ;;  %464 = vst [vmem:[%s229_s11 + $0x18] sm:$0x3f] %v460_v2 }
 0x113 PF: > { %p10_p9 = scmp.ge.s32.totalorder %s683_s16, 6   ;;  %s794_s12 = smov %s638_s13 }
 0x114   : > { %s795_s13 = smov %s692_s19  ;;  %s796_s14 = smov %s683_s16 }
 0x115   :  { %12 = sbr.rel (!%p10_p9) target bundleno = 2 (0x2), region = 90 }

// kernel: net_forward.11
= control target key start
LH: loop header
LB: loop body
LE: loop exit
PB: predicated region body
PF: predicated region fallthrough
CT: control target
= control target key end

     0   :  { %v287_v1 = vmov 0   ;;  %vm122_vm0 = vcmask 1042432   ;;  %vm118_vm1 = vcmask 441344   ;;  %s383_s1 = inlined_call_operand.vmem [shape: bf16[54,512], index: 1, kind: input, shape index: {}]   ;;  %s384_s2 = inlined_call_operand.vmem [shape: f32[12,1], index: 2, kind: input, shape index: {}]   ;;  %s385_s0 = inlined_call_operand.vmem [shape: bf16[12,54], index: 0, kind: input, shape index: {}]   ;;  %s386_s3 = inlined_call_operand.vmem [shape: f32[12,512], index: 3, kind: output, shape index: {}]  }
   0x1   :  { %v264_v0 = vld [vmem:[%s383_s1 + $0x4] ss:$16 sps:$4 sm:$0xff]   ;;  %167 = vmatprep.mubr.bf16.mxu0 %v287_v1  ;;  %210 = vmatprep.mubr.bf16.mxu1 %v287_v1  ;;  %v266_v2 = vld [vmem:[%s383_s1 + $0xc] ss:$16 sps:$4 sm:$0xff]   ;;  %v268_v3 = vld [vmem:[%s383_s1] ss:$16 sps:$4 sm:$0xff]  }
   0x2   :  { %263 = vset.pattern.permute.xlu0 %v287_v1  ;;  %135 = vmatprep.subr.bf16.mxu0 %v264_v0  ;;  %v269_v4 = vld [vmem:[%s383_s1 + $0x8] ss:$16 sps:$4 sm:$0xff]   ;;  %v270_v5 = vld [vmem:[%s383_s1 + $0x24] ss:$16 sps:$4 sm:$0xff]   ;;  %v272_v6 = vld [vmem:[%s383_s1 + $0x2c] ss:$16 sps:$4 sm:$0xff]  }
   0x3   :  { %178 = vmatprep.subr.bf16.mxu1 %v266_v2  ;;  %136 = vmatpush1.bf16.msra.mxu0 %v268_v3  ;;  %v274_v7 = vld [vmem:[%s383_s1 + $0x20] ss:$16 sps:$4 sm:$0xff]   ;;  %v275_v8 = vld [vmem:[%s383_s1 + $0x28] ss:$16 sps:$4 sm:$0xff]   ;;  %v276_v9 = vld [vmem:[%s383_s1 + $0x44] ss:$16 sps:$4 sm:$0xff]  }
   0x4   :  { %179 = vmatpush1.bf16.msra.mxu1 %v269_v4  ;;  %137 = vmatprep.subr.bf16.mxu0 %v270_v5  ;;  %v278_v10 = vld [vmem:[%s383_s1 + $0x4c] ss:$16 sps:$4 sm:$0xff]   ;;  %v280_v11 = vld [vmem:[%s383_s1 + $0x40] ss:$16 sps:$4 sm:$0xff]   ;;  %v281_v12 = vld [vmem:[%s383_s1 + $0x48] ss:$16 sps:$4 sm:$0xff]  }
   0x5   :  { %180 = vmatprep.subr.bf16.mxu1 %v272_v6  ;;  %v29_v13 = vld [vmem:[%s383_s1 + $0x60] sm:$0x77]  ;;  %v30_v14 = vld [vmem:[%s383_s1 + $0x68] sm:$0x77] }
   0x6   :  { %v255_v15 = vcombine.high %v29_v13, %v29_v13  ;;  %v257_v16 = vcombine.high %v30_v14, %v30_v14  ;;  %v254_v17 = vcombine.low %v29_v13, %v29_v13  ;;  %v31_v18 = vld [vmem:[%s384_s2] sm:$0xff]  ;;  %v256_v19 = vcombine.low %v30_v14, %v30_v14  ;;  %v32_v20 = vld [vmem:[%s384_s2 + $0x8] sm:$0xf] }
   0x7   :  { %138 = vmatpush1.bf16.msra.mxu0 %v274_v7  ;;  %35 = vperm.xlu0 %263, %v31_v18   ;;  %v286_v23 = vld [vmem:[%s385_s0] sm:$0x3f]  }
   0x8   :  { %181 = vmatpush1.bf16.msra.mxu1 %v275_v8  ;;  %139 = vmatprep.subr.bf16.mxu0 %v276_v9  ;;  %v124_v21 = vsel %vm122_vm0, %v254_v17, 0  ;;  %v130_v22 = vsel %vm122_vm0, %v256_v19, 0 }
   0x9   :  { %182 = vmatprep.subr.bf16.mxu1 %v278_v10 }
   0xb   :  { %140 = vmatpush1.bf16.msra.mxu0 %v280_v11  ;;  %40 = vperm.xlu0 %263, %v32_v20  }
   0xc   :  { %183 = vmatpush1.bf16.msra.mxu1 %v281_v12  ;;  %258 = vmatprep.subr.msk.bf16.mxu0 %vm122_vm0, %v255_v15 }
   0xd   :  { %260 = vmatprep.subr.msk.bf16.mxu1 %vm122_vm0, %v257_v16 }
   0xf   :  { %142 = vmatpush1.bf16.msra.mxu0 %v124_v21 }
  0x10   :  { %185 = vmatpush1.bf16.msra.mxu1 %v130_v22 }
  0x12   :  { %259 = vmatmul.mubr.msk.bf16.vlgmr.msra.gmra.mrb[0].mxu0 %vm118_vm1, %v286_v23 }
  0x13   :  { %261 = vmatmul.mubr.msk.bf16.vlgmr.msra.gmra.mrb[0].mxu1 %vm118_vm1, %v286_v23 }
  0x86   :  { %v36_v24 = vpop.permute.xlu0 %35 }
  0x8a   :  { %v41_v25 = vpop.permute.xlu0 %40 }
  0xe5   :  { %v169_v26 = vpop.f32.mrb[0].mxu0 }
  0xe6   :  { %v212_v27 = vpop.f32.mrb[0].mxu1  ;;  %v170_v28 = vadd.f32 %v169_v26, %v36_v24  ;;  %v171_v30 = vpop.f32.mrb[1].mxu0 }
  0xe7   :  { %v213_v29 = vadd.f32 %v212_v27, %v36_v24  ;;  %v214_v31 = vpop.f32.mrb[1].mxu1  ;;  %v172_v32 = vadd.f32 %v171_v30, %v36_v24  ;;  %v173_v34 = vpop.f32.mrb[2].mxu0 }
  0xe8   :  { %v215_v33 = vadd.f32 %v214_v31, %v36_v24  ;;  %v216_v35 = vpop.f32.mrb[2].mxu1  ;;  %v221_v36 = vmax.f32 %v170_v28, 0.0  ;;  %v174_v38 = vadd.f32 %v173_v34, %v41_v25  ;;  %v175_v40 = vpop.f32.mrb[3].mxu0 }
  0xe9   :  { %v223_v37 = vmax.f32 %v213_v29, 0.0  ;;  %v217_v39 = vadd.f32 %v216_v35, %v41_v25  ;;  %v218_v41 = vpop.f32.mrb[3].mxu1  ;;  %v222_v42 = vmax.f32 %v172_v32, 0.0  ;;  %v176_v44 = vadd.f32 %v175_v40, %v41_v25 }
  0xea   :  { %v224_v43 = vmax.f32 %v215_v33, 0.0  ;;  %v219_v45 = vadd.f32 %v218_v41, %v41_v25  ;;  %229 = vst [vmem:[%s386_s3] sm:$0xff] %v221_v36  ;;  %v225_v46 = vmax.f32 %v174_v38, 0.0 }
  0xeb   :  { %231 = vst [vmem:[%s386_s3 + $0x10] sm:$0xff] %v223_v37  ;;  %v227_v47 = vmax.f32 %v217_v39, 0.0  ;;  %230 = vst [vmem:[%s386_s3 + $0x8] sm:$0xff] %v222_v42  ;;  %v226_v48 = vmax.f32 %v176_v44, 0.0 }
  0xec   :  { %232 = vst [vmem:[%s386_s3 + $0x18] sm:$0xff] %v224_v43  ;;  %v228_v49 = vmax.f32 %v219_v45, 0.0  ;;  %233 = vst [vmem:[%s386_s3 + $0x20] sm:$0xf] %v225_v46 }
  0xed   :  { %235 = vst [vmem:[%s386_s3 + $0x30] sm:$0xf] %v227_v47  ;;  %234 = vst [vmem:[%s386_s3 + $0x28] sm:$0xf] %v226_v48 }
  0xee   :  { %236 = vst [vmem:[%s386_s3 + $0x38] sm:$0xf] %v228_v49 }

// kernel: net_forward.12
= control target key start
LH: loop header
LB: loop body
LE: loop exit
PB: predicated region body
PF: predicated region fallthrough
CT: control target
= control target key end

     0   :  { %v441_v1 = vmov 0   ;;  %vm215_vm0 = vcmask 1045504   ;;  %vm208_vm1 = vcmask 883712   ;;  %s603_s1 = inlined_call_operand.vmem [shape: bf16[108,512], index: 1, kind: input, shape index: {}]   ;;  %s604_s0 = inlined_call_operand.vmem [shape: bf16[24,108], index: 0, kind: input, shape index: {}]   ;;  %s605_s2 = inlined_call_operand.vmem [shape: f32[24,1], index: 2, kind: input, shape index: {}]   ;;  %s606_s3 = inlined_call_operand.vmem [shape: f32[24,512], index: 3, kind: output, shape index: {}]  }
   0x1   :  { %v397_v0 = vld [vmem:[%s603_s1 + $0x4] ss:$16 sps:$4 sm:$0xff]   ;;  %260 = vmatprep.mubr.bf16.mxu0 %v441_v1  ;;  %311 = vmatprep.mubr.bf16.mxu1 %v441_v1  ;;  %v399_v2 = vld [vmem:[%s603_s1 + $0xc] ss:$16 sps:$4 sm:$0xff]   ;;  %v401_v3 = vld [vmem:[%s603_s1] ss:$16 sps:$4 sm:$0xff]  }
   0x2   :  { %395 = vset.pattern.permute.xlu0 %v441_v1  ;;  %396 = vset.pattern.permute.xlu1 %v441_v1  ;;  %v402_v4 = vld [vmem:[%s603_s1 + $0x8] ss:$16 sps:$4 sm:$0xff]   ;;  %v403_v5 = vld [vmem:[%s603_s1 + $0x24] ss:$16 sps:$4 sm:$0xff]   ;;  %v405_v6 = vld [vmem:[%s603_s1 + $0x2c] ss:$16 sps:$4 sm:$0xff]  }
   0x3   :  { %228 = vmatprep.subr.bf16.mxu0 %v397_v0  ;;  %279 = vmatprep.subr.bf16.mxu1 %v399_v2  ;;  %v407_v7 = vld [vmem:[%s603_s1 + $0x20] ss:$16 sps:$4 sm:$0xff]   ;;  %v408_v8 = vld [vmem:[%s603_s1 + $0x28] ss:$16 sps:$4 sm:$0xff]   ;;  %v409_v9 = vld [vmem:[%s603_s1 + $0x44] ss:$16 sps:$4 sm:$0xff]  }
   0x4   :  { %229 = vmatpush1.bf16.msra.mxu0 %v401_v3  ;;  %280 = vmatpush1.bf16.msra.mxu1 %v402_v4  ;;  %v411_v10 = vld [vmem:[%s603_s1 + $0x4c] ss:$16 sps:$4 sm:$0xff]   ;;  %v413_v11 = vld [vmem:[%s603_s1 + $0x40] ss:$16 sps:$4 sm:$0xff]   ;;  %v414_v12 = vld [vmem:[%s603_s1 + $0x48] ss:$16 sps:$4 sm:$0xff]  }
   0x5   :  { %230 = vmatprep.subr.bf16.mxu0 %v403_v5  ;;  %281 = vmatprep.subr.bf16.mxu1 %v405_v6  ;;  %v415_v13 = vld [vmem:[%s603_s1 + $0x64] ss:$16 sps:$4 sm:$0xff]   ;;  %v417_v14 = vld [vmem:[%s603_s1 + $0x6c] ss:$16 sps:$4 sm:$0xff]   ;;  %v419_v15 = vld [vmem:[%s603_s1 + $0x60] ss:$16 sps:$4 sm:$0xff]  }
   0x6   :  { %v420_v16 = vld [vmem:[%s603_s1 + $0x68] ss:$16 sps:$4 sm:$0xff]   ;;  %v421_v17 = vld [vmem:[%s603_s1 + $0x84] ss:$16 sps:$4 sm:$0xff]   ;;  %v423_v18 = vld [vmem:[%s603_s1 + $0x8c] ss:$16 sps:$4 sm:$0xff]  }
   0x7   :  { %v425_v19 = vld [vmem:[%s603_s1 + $0x80] ss:$16 sps:$4 sm:$0xff]   ;;  %v426_v20 = vld [vmem:[%s603_s1 + $0x88] ss:$16 sps:$4 sm:$0xff]   ;;  %v427_v21 = vld [vmem:[%s603_s1 + $0xa4] ss:$16 sps:$4 sm:$0xff]  }
   0x8   :  { %231 = vmatpush1.bf16.msra.mxu0 %v407_v7  ;;  %282 = vmatpush1.bf16.msra.mxu1 %v408_v8  ;;  %v429_v22 = vld [vmem:[%s603_s1 + $0xac] ss:$16 sps:$4 sm:$0xff]   ;;  %v431_v23 = vld [vmem:[%s603_s1 + $0xa0] ss:$16 sps:$4 sm:$0xff]   ;;  %v432_v24 = vld [vmem:[%s603_s1 + $0xa8] ss:$16 sps:$4 sm:$0xff]  }
   0x9   :  { %232 = vmatprep.subr.bf16.mxu0 %v409_v9  ;;  %283 = vmatprep.subr.bf16.mxu1 %v411_v10  ;;  %v433_v25 = vld [vmem:[%s603_s1 + $0xc4] ss:$16 sps:$4 sm:$0x3f]   ;;  %v435_v26 = vld [vmem:[%s603_s1 + $0xcc] ss:$16 sps:$4 sm:$0x3f]  }
   0xa   :  { %v437_v27 = vld [vmem:[%s603_s1 + $0xc0] ss:$16 sps:$4 sm:$0x3f]   ;;  %v438_v28 = vld [vmem:[%s603_s1 + $0xc8] ss:$16 sps:$4 sm:$0x3f]  }
   0xb   :  { %v46_v29 = vld [vmem:[%s605_s2] sm:$0xff]  ;;  %v48_v30 = vld [vmem:[%s605_s2 + $0x10] sm:$0xff]  ;;  %v47_v31 = vld [vmem:[%s605_s2 + $0x8] sm:$0xff]  ;;  %v217_v32 = vsel %vm215_vm0, %v437_v27, 0  ;;  %v223_v33 = vsel %vm215_vm0, %v438_v28, 0 }
   0xc   :  { %233 = vmatpush1.bf16.msra.mxu0 %v413_v11  ;;  %284 = vmatpush1.bf16.msra.mxu1 %v414_v12  ;;  %v439_v34 = vld [vmem:[%s604_s0] sm:$0xff]   ;;  %v440_v35 = vld [vmem:[%s604_s0 + $0x8] ss:$0 sps:$4 sm:$0xff]  }
   0xd   :  { %234 = vmatprep.subr.bf16.mxu0 %v415_v13  ;;  %285 = vmatprep.subr.bf16.mxu1 %v417_v14 }
   0xe   :  { %51 = vperm.xlu0 %395, %v46_v29   ;;  %61 = vperm.xlu1 %396, %v48_v30  }
  0x10   :  { %235 = vmatpush1.bf16.msra.mxu0 %v419_v15  ;;  %286 = vmatpush1.bf16.msra.mxu1 %v420_v16 }
  0x11   :  { %236 = vmatprep.subr.bf16.mxu0 %v421_v17  ;;  %287 = vmatprep.subr.bf16.mxu1 %v423_v18 }
  0x12   :  { %56 = vperm.xlu0 %395, %v47_v31  }
  0x14   :  { %237 = vmatpush1.bf16.msra.mxu0 %v425_v19  ;;  %288 = vmatpush1.bf16.msra.mxu1 %v426_v20 }
  0x15   :  { %238 = vmatprep.subr.bf16.mxu0 %v427_v21  ;;  %289 = vmatprep.subr.bf16.mxu1 %v429_v22 }
  0x18   :  { %239 = vmatpush1.bf16.msra.mxu0 %v431_v23  ;;  %290 = vmatpush1.bf16.msra.mxu1 %v432_v24 }
  0x19   :  { %388 = vmatprep.subr.msk.bf16.mxu0 %vm215_vm0, %v433_v25  ;;  %391 = vmatprep.subr.msk.bf16.mxu1 %vm215_vm0, %v435_v26 }
  0x1c   :  { %241 = vmatpush1.bf16.msra.mxu0 %v217_v32  ;;  %292 = vmatpush1.bf16.msra.mxu1 %v223_v33 }
  0x1f   :  { %389 = vmatmul.mubr.msk.bf16.vlgmr.msra.gmra.mrb[0].mxu0 %vm208_vm1, %v439_v34  ;;  %392 = vmatmul.mubr.msk.bf16.vlgmr.msra.gmra.mrb[0].mxu1 %vm208_vm1, %v439_v34 }
  0x20   :  { %270 = vmatprep.mubr.bf16.mxu0 %v441_v1  ;;  %321 = vmatprep.mubr.bf16.mxu1 %v441_v1 }
  0x27   :  { %390 = vmatmul.mubr.msk.bf16.gmra.mrb[4].mxu0 %vm208_vm1, %v440_v35  ;;  %393 = vmatmul.mubr.msk.bf16.gmra.mrb[4].mxu1 %vm208_vm1, %v440_v35 }
  0x8d   :  { %v52_v36 = vpop.permute.xlu0 %51  ;;  %v62_v62 = vpop.permute.xlu1 %61 }
  0x91   :  { %v57_v37 = vpop.permute.xlu0 %56 }
  0xf2   :  { %v262_v38 = vpop.f32.mrb[0].mxu0  ;;  %v313_v39 = vpop.f32.mrb[0].mxu1 }
  0xf3   :  { %v263_v40 = vadd.f32 %v262_v38, %v52_v36  ;;  %v314_v41 = vadd.f32 %v313_v39, %v52_v36  ;;  %v264_v42 = vpop.f32.mrb[1].mxu0  ;;  %v315_v43 = vpop.f32.mrb[1].mxu1 }
  0xf4   :  { %v265_v44 = vadd.f32 %v264_v42, %v52_v36  ;;  %v316_v45 = vadd.f32 %v315_v43, %v52_v36  ;;  %v266_v46 = vpop.f32.mrb[2].mxu0  ;;  %v317_v47 = vpop.f32.mrb[2].mxu1 }
  0xf5   :  { %v330_v48 = vmax.f32 %v263_v40, 0.0  ;;  %v332_v49 = vmax.f32 %v314_v41, 0.0  ;;  %v267_v50 = vadd.f32 %v266_v46, %v57_v37  ;;  %v318_v51 = vadd.f32 %v317_v47, %v57_v37  ;;  %v268_v52 = vpop.f32.mrb[3].mxu0  ;;  %v319_v53 = vpop.f32.mrb[3].mxu1 }
  0xf6   :  { %v331_v54 = vmax.f32 %v265_v44, 0.0  ;;  %v333_v55 = vmax.f32 %v316_v45, 0.0  ;;  %v269_v56 = vadd.f32 %v268_v52, %v57_v37  ;;  %v320_v57 = vadd.f32 %v319_v53, %v57_v37 }
  0xf7   :  { %342 = vst [vmem:[%s606_s3] sm:$0xff] %v330_v48  ;;  %344 = vst [vmem:[%s606_s3 + $0x10] sm:$0xff] %v332_v49  ;;  %v334_v58 = vmax.f32 %v267_v50, 0.0  ;;  %v336_v59 = vmax.f32 %v318_v51, 0.0 }
  0xf8   :  { %343 = vst [vmem:[%s606_s3 + $0x8] sm:$0xff] %v331_v54  ;;  %345 = vst [vmem:[%s606_s3 + $0x18] sm:$0xff] %v333_v55  ;;  %v335_v60 = vmax.f32 %v269_v56, 0.0  ;;  %v337_v61 = vmax.f32 %v320_v57, 0.0 }
  0xf9   :  { %346 = vst [vmem:[%s606_s3 + $0x20] sm:$0xff] %v334_v58  ;;  %348 = vst [vmem:[%s606_s3 + $0x30] sm:$0xff] %v336_v59 }
  0xfa   :  { %347 = vst [vmem:[%s606_s3 + $0x28] sm:$0xff] %v335_v60  ;;  %349 = vst [vmem:[%s606_s3 + $0x38] sm:$0xff] %v337_v61  ;;  %v272_v63 = vpop.f32.mrb[4].mxu0  ;;  %v323_v0 = vpop.f32.mrb[4].mxu1 }
  0xfb   :  { %v273_v1 = vadd.f32 %v272_v63, %v62_v62  ;;  %v324_v2 = vadd.f32 %v323_v0, %v62_v62  ;;  %v274_v3 = vpop.f32.mrb[5].mxu0  ;;  %v325_v4 = vpop.f32.mrb[5].mxu1 }
  0xfc   :  { %v275_v5 = vadd.f32 %v274_v3, %v62_v62  ;;  %v326_v6 = vadd.f32 %v325_v4, %v62_v62  ;;  %v276_v7 = vpop.f32.mrb[6].mxu0  ;;  %v327_v8 = vpop.f32.mrb[6].mxu1 }
  0xfd   :  { %v338_v9 = vmax.f32 %v273_v1, 0.0  ;;  %v340_v10 = vmax.f32 %v324_v2, 0.0  ;;  %v277_v11 = vpop.f32.mrb[7].mxu0  ;;  %v328_v12 = vpop.f32.mrb[7].mxu1 }
  0xfe   :  { %v339_v13 = vmax.f32 %v275_v5, 0.0  ;;  %v341_v14 = vmax.f32 %v326_v6, 0.0 }
  0xff   :  { %350 = vst [vmem:[%s606_s3 + $0x40] sm:$0xff] %v338_v9  ;;  %352 = vst [vmem:[%s606_s3 + $0x50] sm:$0xff] %v340_v10 }
 0x100   :  { %351 = vst [vmem:[%s606_s3 + $0x48] sm:$0xff] %v339_v13  ;;  %353 = vst [vmem:[%s606_s3 + $0x58] sm:$0xff] %v341_v14 }

// kernel: net_forward.13
= control target key start
LH: loop header
LB: loop body
LE: loop exit
PB: predicated region body
PF: predicated region fallthrough
CT: control target
= control target key end

     0   :  { %v877_v1 = vmov 0   ;;  %vm512_vm0 = vcmask 1043456   ;;  %vm508_vm1 = vcmask 719872   ;;  %s1158_s1 = inlined_call_operand.vmem [shape: bf16[600,256], index: 1, kind: input, shape index: {}]   ;;  %s1159_s0 = inlined_call_operand.vmem [shape: bf16[16,600], index: 0, kind: input, shape index: {}]   ;;  %s1160_s2 = inlined_call_operand.vmem [shape: f32[16,1], index: 2, kind: input, shape index: {}]   ;;  %s1161_s3 = inlined_call_operand.vmem [shape: f32[16,256], index: 3, kind: output, shape index: {}]  }
   0x1   :  { %v757_v0 = vld [vmem:[%s1158_s1 + $0x104] ss:$8 sps:$4 sm:$0xff]   ;;  %756 = vset.pattern.permute.xlu0 %v877_v1  ;;  %v759_v2 = vld [vmem:[%s1158_s1 + $0x100] ss:$8 sps:$4 sm:$0xff]   ;;  %v760_v3 = vld [vmem:[%s1158_s1 + $0x114] ss:$8 sps:$4 sm:$0xff]  }
   0x2   :  { %562 = vmatprep.subr.bf16.mxu0 %v757_v0  ;;  %v762_v4 = vld [vmem:[%s1158_s1 + $0x110] ss:$8 sps:$4 sm:$0xff]   ;;  %v763_v5 = vld [vmem:[%s1158_s1 + $0x124] ss:$8 sps:$4 sm:$0xff]   ;;  %v765_v6 = vld [vmem:[%s1158_s1 + $0x120] ss:$8 sps:$4 sm:$0xff]  }
   0x3   :  { %563 = vmatpush1.bf16.msra.mxu0 %v759_v2  ;;  %v772_v7 = vld [vmem:[%s1158_s1 + $0x4] ss:$8 sps:$4 sm:$0xff]   ;;  %v774_v8 = vld [vmem:[%s1158_s1] ss:$8 sps:$4 sm:$0xff]   ;;  %v766_v9 = vld [vmem:[%s1158_s1 + $0x134] ss:$8 sps:$4 sm:$0xff]  }
   0x4   :  { %564 = vmatprep.subr.bf16.mxu0 %v760_v3  ;;  %519 = vmatprep.subr.bf16.mxu1 %v772_v7  ;;  %v778_v10 = vld [vmem:[%s1158_s1 + $0x14] ss:$8 sps:$4 sm:$0xff]   ;;  %v780_v11 = vld [vmem:[%s1158_s1 + $0x10] ss:$8 sps:$4 sm:$0xff]   ;;  %v769_v13 = vld [vmem:[%s1158_s1 + $0x144] ss:$8 sps:$4 sm:$0xff]  }
   0x5   :  { %520 = vmatpush1.bf16.msra.mxu1 %v774_v8  ;;  %v768_v12 = vld [vmem:[%s1158_s1 + $0x130] ss:$8 sps:$4 sm:$0xff]   ;;  %v784_v14 = vld [vmem:[%s1158_s1 + $0x24] ss:$8 sps:$4 sm:$0xff]   ;;  %v786_v15 = vld [vmem:[%s1158_s1 + $0x20] ss:$8 sps:$4 sm:$0xff]  }
   0x6   :  { %521 = vmatprep.subr.bf16.mxu1 %v778_v10  ;;  %v771_v16 = vld [vmem:[%s1158_s1 + $0x140] ss:$8 sps:$4 sm:$0xff]   ;;  %v790_v17 = vld [vmem:[%s1158_s1 + $0x34] ss:$8 sps:$4 sm:$0xff]   ;;  %v792_v19 = vld [vmem:[%s1158_s1 + $0x30] ss:$8 sps:$4 sm:$0xff]  }
   0x7   :  { %565 = vmatpush1.bf16.msra.mxu0 %v762_v4  ;;  %v775_v18 = vld [vmem:[%s1158_s1 + $0x154] ss:$8 sps:$4 sm:$0xff]   ;;  %v777_v20 = vld [vmem:[%s1158_s1 + $0x150] ss:$8 sps:$4 sm:$0xff]   ;;  %v796_v21 = vld [vmem:[%s1158_s1 + $0x44] ss:$8 sps:$4 sm:$0xff]  }
   0x8   :  { %566 = vmatprep.subr.bf16.mxu0 %v763_v5  ;;  %v781_v22 = vld [vmem:[%s1158_s1 + $0x164] ss:$8 sps:$4 sm:$0xff]   ;;  %v798_v23 = vld [vmem:[%s1158_s1 + $0x40] ss:$8 sps:$4 sm:$0xff]   ;;  %v802_v25 = vld [vmem:[%s1158_s1 + $0x54] ss:$8 sps:$4 sm:$0xff]  }
   0x9   :  { %522 = vmatpush1.bf16.msra.mxu1 %v780_v11  ;;  %v783_v24 = vld [vmem:[%s1158_s1 + $0x160] ss:$8 sps:$4 sm:$0xff]   ;;  %v787_v26 = vld [vmem:[%s1158_s1 + $0x174] ss:$8 sps:$4 sm:$0xff]   ;;  %v804_v27 = vld [vmem:[%s1158_s1 + $0x50] ss:$8 sps:$4 sm:$0xff]  }
   0xa   :  { %523 = vmatprep.subr.bf16.mxu1 %v784_v14  ;;  %v789_v28 = vld [vmem:[%s1158_s1 + $0x170] ss:$8 sps:$4 sm:$0xff]   ;;  %v808_v29 = vld [vmem:[%s1158_s1 + $0x64] ss:$8 sps:$4 sm:$0xff]   ;;  %v810_v31 = vld [vmem:[%s1158_s1 + $0x60] ss:$8 sps:$4 sm:$0xff]  }
   0xb   :  { %567 = vmatpush1.bf16.msra.mxu0 %v765_v6  ;;  %v793_v30 = vld [vmem:[%s1158_s1 + $0x184] ss:$8 sps:$4 sm:$0xff]   ;;  %v795_v32 = vld [vmem:[%s1158_s1 + $0x180] ss:$8 sps:$4 sm:$0xff]   ;;  %v814_v33 = vld [vmem:[%s1158_s1 + $0x74] ss:$8 sps:$4 sm:$0xff]  }
   0xc   :  { %568 = vmatprep.subr.bf16.mxu0 %v766_v9  ;;  %v799_v34 = vld [vmem:[%s1158_s1 + $0x194] ss:$8 sps:$4 sm:$0xff]   ;;  %v816_v35 = vld [vmem:[%s1158_s1 + $0x70] ss:$8 sps:$4 sm:$0xff]   ;;  %v820_v37 = vld [vmem:[%s1158_s1 + $0x84] ss:$8 sps:$4 sm:$0xff]  }
   0xd   :  { %524 = vmatpush1.bf16.msra.mxu1 %v786_v15  ;;  %v801_v36 = vld [vmem:[%s1158_s1 + $0x190] ss:$8 sps:$4 sm:$0xff]   ;;  %v805_v38 = vld [vmem:[%s1158_s1 + $0x1a4] ss:$8 sps:$4 sm:$0xff]   ;;  %v822_v39 = vld [vmem:[%s1158_s1 + $0x80] ss:$8 sps:$4 sm:$0xff]  }
   0xe   :  { %525 = vmatprep.subr.bf16.mxu1 %v790_v17  ;;  %v843_v40 = vld [vmem:[%s1159_s0 + $0xc] ss:$20 sps:$4 sm:$0xff]   ;;  %v826_v42 = vld [vmem:[%s1158_s1 + $0x94] ss:$8 sps:$4 sm:$0xff]   ;;  %v828_v44 = vld [vmem:[%s1158_s1 + $0x90] ss:$8 sps:$4 sm:$0xff]  }
   0xf   :  { %569 = vmatpush1.bf16.msra.mxu0 %v768_v12  ;;  %v807_v41 = vld [vmem:[%s1158_s1 + $0x1a0] ss:$8 sps:$4 sm:$0xff]   ;;  %v811_v43 = vld [vmem:[%s1158_s1 + $0x1b4] ss:$8 sps:$4 sm:$0xff]   ;;  %594 = vmatprep.mubr.bf16.mxu0 %v843_v40  ;;  %v813_v45 = vld [vmem:[%s1158_s1 + $0x1b0] ss:$8 sps:$4 sm:$0xff]  }
  0x10   :  { %570 = vmatprep.subr.bf16.mxu0 %v769_v13  ;;  %v832_v46 = vld [vmem:[%s1158_s1 + $0xa4] ss:$8 sps:$4 sm:$0xff]   ;;  %v834_v48 = vld [vmem:[%s1158_s1 + $0xa0] ss:$8 sps:$4 sm:$0xff]   ;;  %v838_v50 = vld [vmem:[%s1158_s1 + $0xb4] ss:$8 sps:$4 sm:$0xff]  }
  0x11   :  { %526 = vmatpush1.bf16.msra.mxu1 %v792_v19  ;;  %v817_v47 = vld [vmem:[%s1158_s1 + $0x1c4] ss:$8 sps:$4 sm:$0xff]   ;;  %v819_v49 = vld [vmem:[%s1158_s1 + $0x1c0] ss:$8 sps:$4 sm:$0xff]   ;;  %v823_v51 = vld [vmem:[%s1158_s1 + $0x1d4] ss:$8 sps:$4 sm:$0xff]  }
  0x12   :  { %527 = vmatprep.subr.bf16.mxu1 %v796_v21  ;;  %v825_v52 = vld [vmem:[%s1158_s1 + $0x1d0] ss:$8 sps:$4 sm:$0xff]   ;;  %v847_v54 = vld [vmem:[%s1158_s1 + $0xc4] ss:$8 sps:$4 sm:$0xff]   ;;  %v849_v58 = vld [vmem:[%s1158_s1 + $0xc0] ss:$8 sps:$4 sm:$0xff]  }
  0x13   :  { %571 = vmatpush1.bf16.msra.mxu0 %v771_v16  ;;  %v840_v53 = vld [vmem:[%s1158_s1 + $0xb0] ss:$8 sps:$4 sm:$0xff]   ;;  %v829_v56 = vld [vmem:[%s1158_s1 + $0x1e4] ss:$8 sps:$4 sm:$0xff]   ;;  %v831_v59 = vld [vmem:[%s1158_s1 + $0x1e0] ss:$8 sps:$4 sm:$0xff]  }
  0x14   :  { %572 = vmatprep.subr.bf16.mxu0 %v775_v18  ;;  %v873_v55 = vld [vmem:[%s1159_s0 + $0x4] ss:$20 sps:$4 sm:$0xff]   ;;  %v853_v60 = vld [vmem:[%s1158_s1 + $0xd4] ss:$8 sps:$4 sm:$0xff]   ;;  %v97_v61 = vld [vmem:[%s1160_s2 + $0x8] sm:$0xff] }
  0x15   :  { %528 = vmatpush1.bf16.msra.mxu1 %v798_v23  ;;  %551 = vmatprep.mubr.bf16.mxu1 %v873_v55  ;;  %v96_v57 = vld [vmem:[%s1160_s2] sm:$0xff]  ;;  %v835_v62 = vld [vmem:[%s1158_s1 + $0x1f4] ss:$8 sps:$4 sm:$0xff]   ;;  %v855_v63 = vld [vmem:[%s1158_s1 + $0xd0] ss:$8 sps:$4 sm:$0xff]  }
  0x16   :  { %529 = vmatprep.subr.bf16.mxu1 %v802_v25  ;;  %100 = vperm.xlu0 %756, %v96_v57   ;;  %v837_v0 = vld [vmem:[%s1158_s1 + $0x1f0] ss:$8 sps:$4 sm:$0xff]   ;;  %v859_v2 = vld [vmem:[%s1158_s1 + $0xe4] ss:$8 sps:$4 sm:$0xff]   ;;  %v841_v4 = vld [vmem:[%s1159_s0 + $0x8] ss:$20 sps:$4 sm:$0xff]  }
  0x17   :  { %573 = vmatpush1.bf16.msra.mxu0 %v777_v20  ;;  %v846_v3 = vld [vmem:[%s1158_s1 + $0x204] ss:$8 sps:$4 sm:$0xff]   ;;  %v861_v5 = vld [vmem:[%s1158_s1 + $0xe0] ss:$8 sps:$4 sm:$0xff]   ;;  %v865_v7 = vld [vmem:[%s1158_s1 + $0xf4] ss:$8 sps:$4 sm:$0xff]  }
  0x18   :  { %574 = vmatprep.subr.bf16.mxu0 %v781_v22  ;;  %v844_v6 = vld [vmem:[%s1158_s1 + $0x200] ss:$8 sps:$4 sm:$0xff]   ;;  %v852_v8 = vld [vmem:[%s1158_s1 + $0x214] ss:$8 sps:$4 sm:$0xff]   ;;  %v867_v9 = vld [vmem:[%s1158_s1 + $0xf0] ss:$8 sps:$4 sm:$0xff]  }
  0x19   :  { %530 = vmatpush1.bf16.msra.mxu1 %v804_v27  ;;  %v850_v10 = vld [vmem:[%s1158_s1 + $0x210] ss:$8 sps:$4 sm:$0xff]   ;;  %v858_v11 = vld [vmem:[%s1158_s1 + $0x224] ss:$8 sps:$4 sm:$0xff]   ;;  %v871_v12 = vld [vmem:[%s1159_s0] ss:$20 sps:$4 sm:$0xff]  }
  0x1a   :  { %531 = vmatprep.subr.bf16.mxu1 %v808_v29  ;;  %105 = vperm.xlu0 %756, %v97_v61   ;;  %v856_v13 = vld [vmem:[%s1158_s1 + $0x220] ss:$8 sps:$4 sm:$0xff]   ;;  %v864_v14 = vld [vmem:[%s1158_s1 + $0x234] ss:$8 sps:$4 sm:$0xff]   ;;  %v870_v15 = vld [vmem:[%s1158_s1 + $0x244] ss:$8 sps:$4 sm:$0xff]  }
  0x1b   :  { %575 = vmatpush1.bf16.msra.mxu0 %v783_v24  ;;  %v95_v16 = vld [vmem:[%s1158_s1 + $0x250] sm:$0xff]  ;;  %v868_v17 = vld [vmem:[%s1158_s1 + $0x240] ss:$8 sps:$4 sm:$0xff]  }
  0x1c   :  { %576 = vmatprep.subr.bf16.mxu0 %v787_v26  ;;  %v740_v18 = vcombine.high %v95_v16, %v95_v16  ;;  %v739_v19 = vcombine.low %v95_v16, %v95_v16  ;;  %v876_v21 = vld [vmem:[%s1159_s0 + $0x10] ss:$20 sps:$4 sm:$0xff]  }
  0x1d   :  { %532 = vmatpush1.bf16.msra.mxu1 %v810_v31 }
  0x1e   :  { %533 = vmatprep.subr.bf16.mxu1 %v814_v33  ;;  %v514_v20 = vsel %vm512_vm0, %v739_v19, 0 }
  0x1f   :  { %577 = vmatpush1.bf16.msra.mxu0 %v789_v28 }
  0x20   :  { %578 = vmatprep.subr.bf16.mxu0 %v793_v30 }
  0x21   :  { %534 = vmatpush1.bf16.msra.mxu1 %v816_v35 }
  0x22   :  { %535 = vmatprep.subr.bf16.mxu1 %v820_v37 }
  0x23   :  { %579 = vmatpush1.bf16.msra.mxu0 %v795_v32 }
  0x24   :  { %580 = vmatprep.subr.bf16.mxu0 %v799_v34 }
  0x25   :  { %536 = vmatpush1.bf16.msra.mxu1 %v822_v39 }
  0x26   :  { %537 = vmatprep.subr.bf16.mxu1 %v826_v42 }
  0x27   :  { %581 = vmatpush1.bf16.msra.mxu0 %v801_v36 }
  0x28   :  { %582 = vmatprep.subr.bf16.mxu0 %v805_v38 }
  0x29   :  { %538 = vmatpush1.bf16.msra.mxu1 %v828_v44 }
  0x2a   :  { %539 = vmatprep.subr.bf16.mxu1 %v832_v46 }
  0x2b   :  { %583 = vmatpush1.bf16.msra.mxu0 %v807_v41 }
  0x2c   :  { %584 = vmatprep.subr.bf16.mxu0 %v811_v43 }
  0x2d   :  { %540 = vmatpush1.bf16.msra.mxu1 %v834_v48 }
  0x2e   :  { %541 = vmatprep.subr.bf16.mxu1 %v838_v50 }
  0x2f   :  { %585 = vmatpush1.bf16.msra.mxu0 %v813_v45 }
  0x30   :  { %586 = vmatprep.subr.bf16.mxu0 %v817_v47 }
  0x31   :  { %542 = vmatpush1.bf16.msra.mxu1 %v840_v53 }
  0x32   :  { %543 = vmatprep.subr.bf16.mxu1 %v847_v54 }
  0x33   :  { %587 = vmatpush1.bf16.msra.mxu0 %v819_v49 }
  0x34   :  { %588 = vmatprep.subr.bf16.mxu0 %v823_v51 }
  0x35   :  { %544 = vmatpush1.bf16.msra.mxu1 %v849_v58 }
  0x36   :  { %545 = vmatprep.subr.bf16.mxu1 %v853_v60 }
  0x37   :  { %589 = vmatpush1.bf16.msra.mxu0 %v825_v52 }
  0x38   :  { %590 = vmatprep.subr.bf16.mxu0 %v829_v56 }
  0x39   :  { %546 = vmatpush1.bf16.msra.mxu1 %v855_v63 }
  0x3a   :  { %547 = vmatprep.subr.bf16.mxu1 %v859_v2 }
  0x3b   :  { %591 = vmatpush1.bf16.msra.mxu0 %v831_v59 }
  0x3c   :  { %592 = vmatprep.subr.bf16.mxu0 %v835_v62 }
  0x3d   :  { %548 = vmatpush1.bf16.msra.mxu1 %v861_v5 }
  0x3e   :  { %549 = vmatprep.subr.bf16.mxu1 %v865_v7 }
  0x3f   :  { %593 = vmatpush1.bf16.msra.mxu0 %v837_v0 }
  0x40   :  { %605 = vmatprep.subr.bf16.mxu0 %v846_v3 }
  0x41   :  { %550 = vmatpush1.bf16.msra.mxu1 %v867_v9 }
  0x42   :  { %595 = vmatmul.mubr.bf16.vlgmr.msra.gmra.mrb[0].mxu0 %v841_v4 }
  0x43   :  { %606 = vmatpush1.bf16.msra.mxu0 %v844_v6  ;;  %637 = vmatprep.mubr.bf16.mxu0 %v877_v1  ;;  %v862_v1 = vld [vmem:[%s1158_s1 + $0x230] ss:$8 sps:$4 sm:$0xff]  }
  0x44   :  { %607 = vmatprep.subr.bf16.mxu0 %v852_v8  ;;  %552 = vmatmul.mubr.bf16.vlgmr.msra.gmra.mrb[0].mxu1 %v871_v12 }
  0x47   :  { %608 = vmatpush1.bf16.msra.mxu0 %v850_v10 }
  0x48   :  { %609 = vmatprep.subr.bf16.mxu0 %v858_v11 }
  0x4b   :  { %610 = vmatpush1.bf16.msra.mxu0 %v856_v13 }
  0x4c   :  { %611 = vmatprep.subr.bf16.mxu0 %v864_v14 }
  0x4f   :  { %612 = vmatpush1.bf16.msra.mxu0 %v862_v1 }
  0x50   :  { %613 = vmatprep.subr.bf16.mxu0 %v870_v15 }
  0x53   :  { %614 = vmatpush1.bf16.msra.mxu0 %v868_v17 }
  0x54   :  { %741 = vmatprep.subr.msk.bf16.mxu0 %vm512_vm0, %v740_v18 }
  0x57   :  { %616 = vmatpush1.bf16.msra.mxu0 %v514_v20 }
  0x5a   :  { %742 = vmatmul.mubr.msk.bf16.vlgmr.msra.gmra.mrb[0].mxu0 %vm508_vm1, %v876_v21 }
  0x95   :  { %v101_v26 = vpop.permute.xlu0 %100 }
  0x99   :  { %v106_v28 = vpop.permute.xlu0 %105 }
 0x117   :  { %v553_v22 = vpop.f32.mrb[0].mxu1 }
 0x118   :  { %v555_v23 = vpop.f32.mrb[1].mxu1  ;;  %v554_v27 = vadd.f32 %v553_v22, %v101_v26 }
 0x119   :  { %v557_v24 = vpop.f32.mrb[2].mxu1  ;;  %v556_v29 = vadd.f32 %v555_v23, %v101_v26 }
 0x11a   :  { %v559_v25 = vpop.f32.mrb[3].mxu1  ;;  %v558_v31 = vadd.f32 %v557_v24, %v106_v28 }
 0x11b   :  { %v560_v34 = vadd.f32 %v559_v25, %v106_v28 }
 0x12d   :  { %v639_v30 = vpop.f32.mrb[0].mxu0 }
 0x12e   :  { %v744_v32 = vadd.f32 %v639_v30, %v554_v27  ;;  %v641_v33 = vpop.f32.mrb[1].mxu0 }
 0x12f   :  { %v746_v35 = vadd.f32 %v641_v33, %v556_v29  ;;  %v643_v36 = vpop.f32.mrb[2].mxu0 }
 0x130   :  { %v648_v37 = vmax.f32 %v744_v32, 0.0  ;;  %v748_v38 = vadd.f32 %v643_v36, %v558_v31  ;;  %v645_v39 = vpop.f32.mrb[3].mxu0 }
 0x131   :  { %v649_v40 = vmax.f32 %v746_v35, 0.0  ;;  %v750_v41 = vadd.f32 %v645_v39, %v560_v34 }
 0x132   :  { %652 = vst [vmem:[%s1161_s3] sm:$0xff] %v648_v37  ;;  %v650_v42 = vmax.f32 %v748_v38, 0.0 }
 0x133   :  { %653 = vst [vmem:[%s1161_s3 + $0x8] sm:$0xff] %v649_v40  ;;  %v651_v43 = vmax.f32 %v750_v41, 0.0 }
 0x134   :  { %654 = vst [vmem:[%s1161_s3 + $0x10] sm:$0xff] %v650_v42 }
 0x135   :  { %655 = vst [vmem:[%s1161_s3 + $0x18] sm:$0xff] %v651_v43 }

// kernel: net_forward.14
= control target key start
LH: loop header
LB: loop body
LE: loop exit
PB: predicated region body
PF: predicated region fallthrough
CT: control target
= control target key end

     0   :  { %s255_s10 = smov 118   ;;  %s256_s19 = smov 127   ;;  %vm228_vm0 = vcmask 72704   ;;  %s527_s0 = inlined_call_operand.vmem [shape: f32[160,20], index: 0, kind: input, shape index: {}]   ;;  %s528_s1 = inlined_call_operand.vmem [shape: f32[160,9], index: 1, kind: output, shape index: {}]  }
   0x1   :  { %v8_v0 = vld [vmem:[%s527_s0] sm:$0xff]  ;;  %v10_v1 = vld [vmem:[%s527_s0 + $0x10] sm:$0xff]  ;;  %v9_v2 = vld [vmem:[%s527_s0 + $0x8] sm:$0xff] }
   0x2   :  { %48 = vrot.lane.b32.xlu0 %v8_v0, %s255_s10  ;;  %52 = vrot.lane.b32.xlu1 %v10_v1, %s255_s10  ;;  %v11_v3 = vld [vmem:[%s527_s0 + $0x18] sm:$0xff]  ;;  %v12_v4 = vld [vmem:[%s527_s0 + $0x20] sm:$0xff] }
   0x3   :  { %v13_v5 = vld [vmem:[%s527_s0 + $0x28] sm:$0xff]  ;;  %v14_v6 = vld [vmem:[%s527_s0 + $0x30] sm:$0xff]  ;;  %v15_v7 = vld [vmem:[%s527_s0 + $0x38] sm:$0xff] }
   0x4   :  { %v16_v8 = vld [vmem:[%s527_s0 + $0x40] sm:$0xff]  ;;  %v17_v9 = vld [vmem:[%s527_s0 + $0x48] sm:$0xff]  ;;  %v18_v10 = vld [vmem:[%s527_s0 + $0x50] sm:$0xff] }
   0x5   :  { %v19_v11 = vld [vmem:[%s527_s0 + $0x58] sm:$0xff]  ;;  %v20_v12 = vld [vmem:[%s527_s0 + $0x60] sm:$0xff]  ;;  %v21_v13 = vld [vmem:[%s527_s0 + $0x68] sm:$0xff] }
   0x6   :  { %50 = vrot.lane.b32.xlu0 %v9_v2, %s255_s10  ;;  %54 = vrot.lane.b32.xlu1 %v11_v3, %s255_s10  ;;  %v22_v14 = vld [vmem:[%s527_s0 + $0x70] sm:$0xff]  ;;  %v23_v15 = vld [vmem:[%s527_s0 + $0x78] sm:$0xff] }
   0x7   :  { %v24_v16 = vld [vmem:[%s527_s0 + $0x80] sm:$0xff]  ;;  %v25_v17 = vld [vmem:[%s527_s0 + $0x88] sm:$0xff]  ;;  %v26_v18 = vld [vmem:[%s527_s0 + $0x90] sm:$0xff] }
   0x8   :  { %v27_v19 = vld [vmem:[%s527_s0 + $0x98] sm:$0xff] }
   0xa   :  { %56 = vrot.lane.b32.xlu0 %v12_v4, %s255_s10  ;;  %58 = vrot.lane.b32.xlu1 %v13_v5, %s255_s10 }
   0xe   :  { %60 = vrot.lane.b32.xlu0 %v14_v6, %s255_s10  ;;  %62 = vrot.lane.b32.xlu1 %v15_v7, %s255_s10 }
  0x12   :  { %64 = vrot.lane.b32.xlu0 %v16_v8, %s255_s10  ;;  %66 = vrot.lane.b32.xlu1 %v17_v9, %s255_s10 }
  0x16   :  { %68 = vrot.lane.b32.xlu0 %v18_v10, %s255_s10  ;;  %70 = vrot.lane.b32.xlu1 %v19_v11, %s255_s10 }
  0x1a   :  { %72 = vrot.lane.b32.xlu0 %v20_v12, %s255_s10  ;;  %74 = vrot.lane.b32.xlu1 %v21_v13, %s255_s10 }
  0x1e   :  { %76 = vrot.lane.b32.xlu0 %v22_v14, %s255_s10  ;;  %78 = vrot.lane.b32.xlu1 %v23_v15, %s255_s10 }
  0x22   :  { %80 = vrot.lane.b32.xlu0 %v24_v16, %s255_s10  ;;  %82 = vrot.lane.b32.xlu1 %v25_v17, %s255_s10 }
  0x26   :  { %84 = vrot.lane.b32.xlu0 %v26_v18, %s255_s10  ;;  %86 = vrot.lane.b32.xlu1 %v27_v19, %s255_s10 }
  0x74   :  { %v49_v20 = vpop.permute.xlu0 %48  ;;  %v53_v21 = vpop.permute.xlu1 %52 }
  0x75   :  { %v347_v22 = vmax.f32 %v8_v0, %v49_v20  ;;  %v351_v23 = vmax.f32 %v10_v1, %v53_v21 }
  0x77   :  { %148 = vrot.lane.b32.xlu0 %v347_v22, %s256_s19 }
  0x78   :  { %v51_v24 = vpop.permute.xlu0 %50  ;;  %v55_v25 = vpop.permute.xlu1 %54 }
  0x79   :  { %v353_v26 = vmax.f32 %v9_v2, %v51_v24  ;;  %v359_v27 = vmax.f32 %v11_v3, %v55_v25 }
  0x7b   :  { %152 = vrot.lane.b32.xlu0 %v351_v23, %s256_s19  ;;  %150 = vrot.lane.b32.xlu1 %v353_v26, %s256_s19 }
  0x7c   :  { %v57_v28 = vpop.permute.xlu0 %56  ;;  %v59_v29 = vpop.permute.xlu1 %58 }
  0x7d   :  { %v361_v30 = vmax.f32 %v12_v4, %v57_v28  ;;  %v367_v31 = vmax.f32 %v13_v5, %v59_v29 }
  0x7f   :  { %154 = vrot.lane.b32.xlu1 %v359_v27, %s256_s19  ;;  %156 = vrot.lane.b32.xlu0 %v361_v30, %s256_s19 }
  0x80   :  { %v61_v32 = vpop.permute.xlu0 %60  ;;  %v63_v33 = vpop.permute.xlu1 %62 }
  0x81   :  { %v369_v34 = vmax.f32 %v14_v6, %v61_v32  ;;  %v375_v35 = vmax.f32 %v15_v7, %v63_v33 }
  0x83   :  { %158 = vrot.lane.b32.xlu1 %v367_v31, %s256_s19  ;;  %160 = vrot.lane.b32.xlu0 %v369_v34, %s256_s19 }
  0x84   :  { %v65_v36 = vpop.permute.xlu0 %64  ;;  %v67_v37 = vpop.permute.xlu1 %66 }
  0x85   :  { %v377_v38 = vmax.f32 %v16_v8, %v65_v36  ;;  %v383_v39 = vmax.f32 %v17_v9, %v67_v37 }
  0x87   :  { %162 = vrot.lane.b32.xlu1 %v375_v35, %s256_s19  ;;  %164 = vrot.lane.b32.xlu0 %v377_v38, %s256_s19 }
  0x88   :  { %v69_v40 = vpop.permute.xlu0 %68  ;;  %v71_v41 = vpop.permute.xlu1 %70 }
  0x89   :  { %v385_v42 = vmax.f32 %v18_v10, %v69_v40  ;;  %v391_v43 = vmax.f32 %v19_v11, %v71_v41 }
  0x8b   :  { %166 = vrot.lane.b32.xlu1 %v383_v39, %s256_s19  ;;  %168 = vrot.lane.b32.xlu0 %v385_v42, %s256_s19 }
  0x8c   :  { %v73_v44 = vpop.permute.xlu0 %72  ;;  %v75_v45 = vpop.permute.xlu1 %74 }
  0x8d   :  { %v393_v46 = vmax.f32 %v20_v12, %v73_v44  ;;  %v399_v47 = vmax.f32 %v21_v13, %v75_v45 }
  0x8f   :  { %170 = vrot.lane.b32.xlu1 %v391_v43, %s256_s19  ;;  %172 = vrot.lane.b32.xlu0 %v393_v46, %s256_s19 }
  0x90   :  { %v77_v48 = vpop.permute.xlu0 %76  ;;  %v79_v49 = vpop.permute.xlu1 %78 }
  0x91   :  { %v401_v50 = vmax.f32 %v22_v14, %v77_v48  ;;  %v407_v51 = vmax.f32 %v23_v15, %v79_v49 }
  0x93   :  { %174 = vrot.lane.b32.xlu1 %v399_v47, %s256_s19  ;;  %176 = vrot.lane.b32.xlu0 %v401_v50, %s256_s19 }
  0x94   :  { %v81_v52 = vpop.permute.xlu0 %80  ;;  %v83_v53 = vpop.permute.xlu1 %82 }
  0x95   :  { %v409_v54 = vmax.f32 %v24_v16, %v81_v52  ;;  %v415_v55 = vmax.f32 %v25_v17, %v83_v53 }
  0x97   :  { %178 = vrot.lane.b32.xlu1 %v407_v51, %s256_s19  ;;  %180 = vrot.lane.b32.xlu0 %v409_v54, %s256_s19 }
  0x98   :  { %v85_v56 = vpop.permute.xlu0 %84  ;;  %v87_v57 = vpop.permute.xlu1 %86 }
  0x99   :  { %v417_v58 = vmax.f32 %v26_v18, %v85_v56  ;;  %v423_v59 = vmax.f32 %v27_v19, %v87_v57 }
  0x9b   :  { %182 = vrot.lane.b32.xlu1 %v415_v55, %s256_s19  ;;  %184 = vrot.lane.b32.xlu0 %v417_v58, %s256_s19 }
  0x9f   :  { %186 = vrot.lane.b32.xlu1 %v423_v59, %s256_s19 }
  0xe9   :  { %v149_v60 = vpop.permute.xlu0 %148 }
  0xea   :  { %v208_v61 = vmax.f32 %v347_v22, %v149_v60 }
  0xec   :  { %229 = vst.msk [vmem:[%s528_s1] sm:$0xff] %vm228_vm0, %v208_v61 }
  0xed   :  { %v151_v62 = vpop.permute.xlu1 %150  ;;  %v153_v63 = vpop.permute.xlu0 %152 }
  0xee   :  { %v209_v0 = vmax.f32 %v353_v26, %v151_v62  ;;  %v210_v1 = vmax.f32 %v351_v23, %v153_v63 }
  0xf0   :  { %230 = vst.msk [vmem:[%s528_s1 + $0x8] sm:$0xff] %vm228_vm0, %v209_v0  ;;  %231 = vst.msk [vmem:[%s528_s1 + $0x10] sm:$0xff] %vm228_vm0, %v210_v1 }
  0xf1   :  { %v155_v2 = vpop.permute.xlu1 %154  ;;  %v157_v3 = vpop.permute.xlu0 %156 }
  0xf2   :  { %v211_v4 = vmax.f32 %v359_v27, %v155_v2  ;;  %v212_v5 = vmax.f32 %v361_v30, %v157_v3 }
  0xf4   :  { %232 = vst.msk [vmem:[%s528_s1 + $0x18] sm:$0xff] %vm228_vm0, %v211_v4  ;;  %233 = vst.msk [vmem:[%s528_s1 + $0x20] sm:$0xff] %vm228_vm0, %v212_v5 }
  0xf5   :  { %v159_v6 = vpop.permute.xlu1 %158  ;;  %v161_v7 = vpop.permute.xlu0 %160 }
  0xf6   :  { %v213_v8 = vmax.f32 %v367_v31, %v159_v6  ;;  %v214_v9 = vmax.f32 %v369_v34, %v161_v7 }
  0xf8   :  { %234 = vst.msk [vmem:[%s528_s1 + $0x28] sm:$0xff] %vm228_vm0, %v213_v8  ;;  %235 = vst.msk [vmem:[%s528_s1 + $0x30] sm:$0xff] %vm228_vm0, %v214_v9 }
  0xf9   :  { %v163_v10 = vpop.permute.xlu1 %162  ;;  %v165_v11 = vpop.permute.xlu0 %164 }
  0xfa   :  { %v215_v12 = vmax.f32 %v375_v35, %v163_v10  ;;  %v216_v13 = vmax.f32 %v377_v38, %v165_v11 }
  0xfc   :  { %236 = vst.msk [vmem:[%s528_s1 + $0x38] sm:$0xff] %vm228_vm0, %v215_v12  ;;  %237 = vst.msk [vmem:[%s528_s1 + $0x40] sm:$0xff] %vm228_vm0, %v216_v13 }
  0xfd   :  { %v167_v14 = vpop.permute.xlu1 %166  ;;  %v169_v15 = vpop.permute.xlu0 %168 }
  0xfe   :  { %v217_v16 = vmax.f32 %v383_v39, %v167_v14  ;;  %v218_v17 = vmax.f32 %v385_v42, %v169_v15 }
 0x100   :  { %238 = vst.msk [vmem:[%s528_s1 + $0x48] sm:$0xff] %vm228_vm0, %v217_v16  ;;  %239 = vst.msk [vmem:[%s528_s1 + $0x50] sm:$0xff] %vm228_vm0, %v218_v17 }
 0x101   :  { %v171_v18 = vpop.permute.xlu1 %170  ;;  %v173_v19 = vpop.permute.xlu0 %172 }
 0x102   :  { %v219_v20 = vmax.f32 %v391_v43, %v171_v18  ;;  %v220_v21 = vmax.f32 %v393_v46, %v173_v19 }
 0x104   :  { %240 = vst.msk [vmem:[%s528_s1 + $0x58] sm:$0xff] %vm228_vm0, %v219_v20  ;;  %241 = vst.msk [vmem:[%s528_s1 + $0x60] sm:$0xff] %vm228_vm0, %v220_v21 }
 0x105   :  { %v175_v22 = vpop.permute.xlu1 %174  ;;  %v177_v23 = vpop.permute.xlu0 %176 }
 0x106   :  { %v221_v24 = vmax.f32 %v399_v47, %v175_v22  ;;  %v222_v25 = vmax.f32 %v401_v50, %v177_v23 }
 0x108   :  { %242 = vst.msk [vmem:[%s528_s1 + $0x68] sm:$0xff] %vm228_vm0, %v221_v24  ;;  %243 = vst.msk [vmem:[%s528_s1 + $0x70] sm:$0xff] %vm228_vm0, %v222_v25 }
 0x109   :  { %v179_v26 = vpop.permute.xlu1 %178  ;;  %v181_v27 = vpop.permute.xlu0 %180 }
 0x10a   :  { %v223_v28 = vmax.f32 %v407_v51, %v179_v26  ;;  %v224_v29 = vmax.f32 %v409_v54, %v181_v27 }
 0x10c   :  { %244 = vst.msk [vmem:[%s528_s1 + $0x78] sm:$0xff] %vm228_vm0, %v223_v28  ;;  %245 = vst.msk [vmem:[%s528_s1 + $0x80] sm:$0xff] %vm228_vm0, %v224_v29 }
 0x10d   :  { %v183_v30 = vpop.permute.xlu1 %182  ;;  %v185_v31 = vpop.permute.xlu0 %184 }
 0x10e   :  { %v225_v32 = vmax.f32 %v415_v55, %v183_v30  ;;  %v226_v33 = vmax.f32 %v417_v58, %v185_v31 }
 0x110   :  { %246 = vst.msk [vmem:[%s528_s1 + $0x88] sm:$0xff] %vm228_vm0, %v225_v32  ;;  %247 = vst.msk [vmem:[%s528_s1 + $0x90] sm:$0xff] %vm228_vm0, %v226_v33 }
 0x111   :  { %v187_v34 = vpop.permute.xlu1 %186 }
 0x112   :  { %v227_v35 = vmax.f32 %v423_v59, %v187_v34 }
 0x114   :  { %248 = vst.msk [vmem:[%s528_s1 + $0x98] sm:$0xff] %vm228_vm0, %v227_v35 }

// kernel: net_forward.15
= control target key start
LH: loop header
LB: loop body
LE: loop exit
PB: predicated region body
PF: predicated region fallthrough
CT: control target
= control target key end

     0   :  { %v418_v0 = vmov 0   ;;  %v419_v15 = vmov 1966171168   ;;  %v85_v17 = vlaneseq  ;;  %vm251_vm0 = vcmask 130048   ;;  %s533_s1 = inlined_call_operand.vmem [shape: bf16[400,128], index: 1, kind: input, shape index: {}]   ;;  %s534_s0 = inlined_call_operand.vmem [shape: bf16[2,400], index: 0, kind: input, shape index: {}]   ;;  %s535_s2 = inlined_call_operand.vmem [shape: f32[1,128], index: 2, kind: input, shape index: {}]   ;;  %s536_s3 = inlined_call_operand.vmem [shape: f32[2,128], index: 3, kind: output, shape index: {}]  }
   0x1   :  { %295 = vmatprep.subr.bf16.mxu1 %v418_v0  ;;  %v393_v1 = vld [vmem:[%s533_s1 + $0x40] sm:$0xff]   ;;  %v396_v4 = vld [vmem:[%s533_s1 + $0x48] sm:$0xff]   ;;  %v399_v7 = vld [vmem:[%s533_s1 + $0x50] sm:$0xff]   ;;  %v83_v16 = vunpack.c.l.s4 %v419_v15 }
   0x2   :  { %v394_v2 = vld [vmem:[%s533_s1 + $0x80] sm:$0xff]   ;;  %369 = vmatprep.subr.bf16.mxu0 %v393_v1  ;;  %v397_v5 = vld [vmem:[%s533_s1 + $0x88] sm:$0xff]   ;;  %v400_v8 = vld [vmem:[%s533_s1 + $0x90] sm:$0xff]   ;;  %v86_v22 = vshrl.u32 %v85_v17, 7 }
   0x3   :  { %v395_v3 = vld [vmem:[%s533_s1] sm:$0xff]   ;;  %296 = vmatpush1.bf16.msra.mxu1 %v394_v2  ;;  %v398_v6 = vld [vmem:[%s533_s1 + $0x8] sm:$0xff]   ;;  %v401_v9 = vld [vmem:[%s533_s1 + $0x10] sm:$0xff]   ;;  %v84_v21 = vunpack.c.0.s8 %v83_v16 }
   0x4   :  { %370 = vmatpush3.bf16.msra.mxu0 %v395_v3  ;;  %297 = vmatprep.subr.bf16.mxu1 %v418_v0  ;;  %v402_v10 = vld [vmem:[%s533_s1 + $0x58] sm:$0xff]   ;;  %v405_v13 = vld [vmem:[%s533_s1 + $0x60] sm:$0xff]   ;;  %v408_v19 = vld [vmem:[%s533_s1 + $0x68] sm:$0xff]  }
   0x5   :  { %371 = vmatprep.subr.bf16.mxu0 %v396_v4  ;;  %v403_v11 = vld [vmem:[%s533_s1 + $0x98] sm:$0xff]   ;;  %v406_v14 = vld [vmem:[%s533_s1 + $0xa0] sm:$0xff]   ;;  %v409_v20 = vld [vmem:[%s533_s1 + $0xa8] sm:$0xff]   ;;  %v87_v27 = vsub.s32 %v84_v21, %v86_v22 }
   0x6   :  { %v404_v12 = vld [vmem:[%s533_s1 + $0x18] sm:$0xff]   ;;  %v407_v18 = vld [vmem:[%s533_s1 + $0x20] sm:$0xff]   ;;  %v410_v23 = vld [vmem:[%s533_s1 + $0x28] sm:$0xff]  }
   0x7   :  { %298 = vmatpush1.bf16.msra.mxu1 %v397_v5  ;;  %v411_v24 = vld [vmem:[%s533_s1 + $0x70] sm:$0xff]   ;;  %v342_v28 = vld.sshfl [vmem:[%s534_s0] sm:$0x33 pattern:$0x75316420]  ;;  %v414_v29 = vld [vmem:[%s533_s1 + $0x78] sm:$0xff]  }
   0x8   :  { %372 = vmatpush3.bf16.msra.mxu0 %v398_v6  ;;  %299 = vmatprep.subr.bf16.mxu1 %v418_v0  ;;  %v412_v25 = vld [vmem:[%s533_s1 + $0xb0] sm:$0xff]   ;;  %v81_v30 = vcombine.high %v342_v28, %v342_v28  ;;  %v415_v31 = vld [vmem:[%s533_s1 + $0xb8] sm:$0xff]   ;;  %v88_v35 = vrot.slane %v342_v28, %v87_v27  ;;  %v417_v36 = vld [vmem:[%s533_s1 + $0xc0] sm:$0xff]  }
   0x9   :  { %373 = vmatprep.subr.bf16.mxu0 %v399_v7  ;;  %v413_v26 = vld [vmem:[%s533_s1 + $0x30] sm:$0xff]   ;;  %v416_v33 = vld [vmem:[%s533_s1 + $0x38] sm:$0xff]   ;;  %v341_v40 = vld [vmem:[%s535_s2] ss:$0 sm:$0xff] }
   0xa   :  { %v95_v32 = vrot.slane %v81_v30, %v87_v27  ;;  %v96_v37 = vcombine.high %v88_v35, %v88_v35 }
   0xb   :  { %300 = vmatpush1.bf16.msra.mxu1 %v400_v8 }
   0xc   :  { %374 = vmatpush3.bf16.msra.mxu0 %v401_v9  ;;  %301 = vmatprep.subr.bf16.mxu1 %v418_v0  ;;  %v97_v34 = vcombine.high %v95_v32, %v95_v32 }
   0xd   :  { %375 = vmatprep.subr.bf16.mxu0 %v402_v10  ;;  %287 = vmatprep.mubr.bf16.mxu0 %v95_v32 }
   0xe   :  { %368 = vmatprep.mubr.msk.bf16.mxu1 %vm251_vm0, %v97_v34 }
   0xf   :  { %302 = vmatpush1.bf16.msra.mxu1 %v403_v11 }
  0x10   :  { %376 = vmatpush3.bf16.msra.mxu0 %v404_v12  ;;  %303 = vmatprep.subr.bf16.mxu1 %v418_v0 }
  0x11   :  { %377 = vmatprep.subr.bf16.mxu0 %v405_v13 }
  0x13   :  { %304 = vmatpush1.bf16.msra.mxu1 %v406_v14 }
  0x14   :  { %378 = vmatpush3.bf16.msra.mxu0 %v407_v18  ;;  %305 = vmatprep.subr.bf16.mxu1 %v418_v0 }
  0x15   :  { %379 = vmatprep.subr.bf16.mxu0 %v408_v19 }
  0x17   :  { %306 = vmatpush1.bf16.msra.mxu1 %v409_v20 }
  0x18   :  { %380 = vmatpush3.bf16.msra.mxu0 %v410_v23  ;;  %307 = vmatprep.subr.bf16.mxu1 %v418_v0 }
  0x19   :  { %381 = vmatprep.subr.bf16.mxu0 %v411_v24 }
  0x1b   :  { %308 = vmatpush1.bf16.msra.mxu1 %v412_v25 }
  0x1c   :  { %382 = vmatpush3.bf16.msra.mxu0 %v413_v26  ;;  %309 = vmatprep.subr.bf16.mxu1 %v418_v0 }
  0x1d   :  { %383 = vmatprep.subr.bf16.mxu0 %v414_v29 }
  0x1f   :  { %310 = vmatpush1.bf16.msra.mxu1 %v415_v31 }
  0x20   :  { %384 = vmatpush3.bf16.msra.mxu0 %v416_v33  ;;  %311 = vmatprep.subr.bf16.mxu1 %v418_v0 }
  0x23   :  { %288 = vmatmul.mubr.bf16.vlgmr.msra.gmra.mrb[0].mxu0 %v88_v35  ;;  %312 = vmatpush1.bf16.msra.mxu1 %v417_v36 }
  0x26   :  { %328 = vmatmul.mubr.bf16.vlgmr.msra.gmra.mrb[0].mxu1 %v96_v37 }
  0xf6   :  { %v385_v38 = vpop.f32.mrb[0].mxu0 }
  0xf7   :  { %v386_v39 = vpop.f32.mrb[1].mxu0 }
  0xf8   :  { %v387_v41 = vadd.f32 %v386_v39, %v385_v38  ;;  %v388_v42 = vpop.f32.mrb[2].mxu0 }
  0xf9   :  { %v389_v43 = vpop.f32.mrb[3].mxu0  ;;  %v329_v44 = vpop.f32.mrb[0].mxu1 }
  0xfa   :  { %v290_v45 = vadd.f32 %v387_v41, %v341_v40  ;;  %v331_v46 = vpop.f32.mrb[1].mxu1 }
  0xfb   :  { %v332_v47 = vpop.f32.mrb[2].mxu1 }
  0xfc   :  { %v330_v48 = vadd.f32 %v329_v44, %v290_v45  ;;  %v333_v49 = vpop.f32.mrb[3].mxu1 }
  0xfe   :  { %v335_v50 = vmax.f32 %v330_v48, 0.0 }
 0x100   :  { %336 = vst [vmem:[%s536_s3] sm:$0x3] %v335_v50 }

// kernel: net_forward.16
= control target key start
LH: loop header
LB: loop body
LE: loop exit
PB: predicated region body
PF: predicated region fallthrough
CT: control target
= control target key end

     0   :  { %v186_v0 = vmov 0.0   ;;  %vm187_vm0 = vmmov 0   ;;  %vm87_vm1 = vcmask 1043456   ;;  %vm83_vm2 = vcmask 982016   ;;  %s241_s1 = inlined_call_operand.vmem [shape: bf16[120,128], index: 1, kind: input, shape index: {}]   ;;  %s242_s0 = inlined_call_operand.vmem [shape: bf16[2,120], index: 0, kind: input, shape index: {}]   ;;  %s243_s2 = inlined_call_operand.vmem [shape: f32[1,128], index: 2, kind: input, shape index: {}]   ;;  %s244_s3 = inlined_call_operand.vmem [shape: f32[2,128], index: 3, kind: output, shape index: {}]  }
   0x1   :  { %156 = vmatprep.subr.bf16.mxu0 %v186_v0  ;;  %v178_v1 = vld [vmem:[%s241_s1] sm:$0xff]   ;;  %172 = vmatprep.mubr.msk.bf16.mxu0 %vm187_vm0, %v186_v0  ;;  %v179_v2 = vld [vmem:[%s241_s1 + $0x8] sm:$0xff]   ;;  %v180_v3 = vld [vmem:[%s241_s1 + $0x10] sm:$0xff]  }
   0x2   :  { %157 = vmatpush3.bf16.msra.mxu0 %v178_v1  ;;  %v181_v4 = vld [vmem:[%s241_s1 + $0x18] sm:$0xff]   ;;  %v182_v5 = vld [vmem:[%s241_s1 + $0x20] sm:$0xff]   ;;  %v183_v6 = vld [vmem:[%s241_s1 + $0x28] sm:$0xff]  }
   0x3   :  { %158 = vmatprep.subr.bf16.mxu0 %v186_v0  ;;  %v184_v7 = vld [vmem:[%s241_s1 + $0x30] sm:$0xff]   ;;  %v185_v8 = vld [vmem:[%s241_s1 + $0x38] ss:$0 sps:$4 sm:$0xff]   ;;  %v15_v10 = vld [vmem:[%s242_s0] sm:$0x1] }
   0x4   :  { %v89_v9 = vsel %vm87_vm1, %v185_v8, 0  ;;  %v137_v11 = vld [vmem:[%s243_s2] ss:$0 sm:$0xff] }
   0x6   :  { %159 = vmatpush3.bf16.msra.mxu0 %v179_v2 }
   0x7   :  { %160 = vmatprep.subr.bf16.mxu0 %v186_v0 }
   0xa   :  { %161 = vmatpush3.bf16.msra.mxu0 %v180_v3 }
   0xb   :  { %162 = vmatprep.subr.bf16.mxu0 %v186_v0 }
   0xe   :  { %163 = vmatpush3.bf16.msra.mxu0 %v181_v4 }
   0xf   :  { %164 = vmatprep.subr.bf16.mxu0 %v186_v0 }
  0x12   :  { %165 = vmatpush3.bf16.msra.mxu0 %v182_v5 }
  0x13   :  { %166 = vmatprep.subr.bf16.mxu0 %v186_v0 }
  0x16   :  { %167 = vmatpush3.bf16.msra.mxu0 %v183_v6 }
  0x17   :  { %168 = vmatprep.subr.bf16.mxu0 %v186_v0 }
  0x1a   :  { %169 = vmatpush3.bf16.msra.mxu0 %v184_v7 }
  0x1b   :  { %170 = vmatprep.subr.bf16.mxu0 %v186_v0 }
  0x1e   :  { %171 = vmatpush3.bf16.msra.mxu0 %v89_v9 }
  0x21   :  { %173 = vmatmul.mubr.msk.bf16.vlgmr.msra.gmra.mrb[0].mxu0 %vm83_vm2, %v15_v10 }
  0xf4   :  { %v125_v12 = vpop.f32.mrb[0].mxu0 }
  0xf5   :  { %v126_v13 = vadd.f32 %v137_v11, %v125_v12  ;;  %v174_v14 = vpop.f32.mrb[1].mxu0 }
  0xf6   :  { %v128_v15 = vpop.f32.mrb[2].mxu0 }
  0xf7   :  { %v131_v16 = vmax.f32 %v126_v13, 0.0  ;;  %v175_v17 = vpop.f32.mrb[3].mxu0 }
  0xf9   :  { %132 = vst [vmem:[%s244_s3] sm:$0x3] %v131_v16 }

// kernel: net_forward.17
= control target key start
LH: loop header
LB: loop body
LE: loop exit
PB: predicated region body
PF: predicated region fallthrough
CT: control target
= control target key end

     0   :  { %v195_v1 = vmov 0.0   ;;  %vm196_vm0 = vmmov 0   ;;  %s254_s0 = inlined_call_operand.vmem [shape: bf16[2,84], index: 0, kind: input, shape index: {}]   ;;  %s255_s1 = inlined_call_operand.vmem [shape: bf16[84,128], index: 1, kind: input, shape index: {}]   ;;  %s256_s2 = inlined_call_operand.vmem [shape: f32[1,128], index: 2, kind: input, shape index: {}]   ;;  %s257_s3 = inlined_call_operand.hbm [shape: f32[2,128], index: 3, kind: output, shape index: {}]  }
   0x1   :  { %v165_v0 = vld [vmem:[%s255_s1] sm:$0xff]   ;;  %146 = vmatprep.subr.bf16.mxu0 %v195_v1  ;;  %v166_v2 = vld [vmem:[%s255_s1 + $0x8] sm:$0xff]   ;;  %158 = vmatprep.mubr.msk.bf16.mxu0 %vm196_vm0, %v195_v1  ;;  %v167_v3 = vld [vmem:[%s255_s1 + $0x10] sm:$0xff]  }
   0x2   :  { %147 = vmatpush3.bf16.msra.mxu0 %v165_v0 }
   0x3   :  { %148 = vmatprep.subr.bf16.mxu0 %v195_v1 }
   0x6   :  { %149 = vmatpush3.bf16.msra.mxu0 %v166_v2 }
   0x7   :  { %8 = vsyncpa [#allocation3], 0  ;;  %150 = vmatprep.subr.bf16.mxu0 %v195_v1  ;;  %v168_v4 = vld [vmem:[%s255_s1 + $0x18] sm:$0xff]   ;;  %v169_v5 = vld [vmem:[%s255_s1 + $0x20] sm:$0xff]   ;;  %vm72_vm1 = vcmask 1041408   ;;  %vm68_vm2 = vcmask 687104  }
   0x8   :  { %v170_v6 = vld [vmem:[%s255_s1 + $0x28] ss:$0 sps:$4 sm:$0x33]   ;;  %v16_v8 = vld [vmem:[%s254_s0] sm:$0x1]  ;;  %s197_s28 = smov [#allocation2]  }
   0x9   :  { %v74_v7 = vsel %vm72_vm1, %v170_v6, 0  ;;  %v131_v9 = vld [vmem:[%s256_s2] ss:$0 sm:$0xff]  ;;  %s123_s29 = sshll.u32 %s197_s28, 4  ;;  %s124_s29 = int_to_ptr.vmem [resolvable:$true] %s123_s29 }
   0xa   :  { %151 = vmatpush3.bf16.msra.mxu0 %v167_v3  ;;  %s171_s1 = scalar_lea.vmem %s124_s29, 32  ;;  %p176_p1 = scmp.lt.s32.totalorder %s124_s29, %s124_s29 }
   0xb   :  { %152 = vmatprep.subr.bf16.mxu0 %v195_v1  ;;  %p172_p0 = scmp.ne.s32.totalorder %s124_s29, %s171_s1  ;;  %p177_p2 = scmp.lt.s32.totalorder %s171_s1, %s171_s1 }
   0xd   :  { %p178_p3 = por %p177_p2, %p176_p1 }
   0xe   :  { %153 = vmatpush3.bf16.msra.mxu0 %v168_v4 }
   0xf   :  { %154 = vmatprep.subr.bf16.mxu0 %v195_v1  ;;  %p179_p4 = pnand %p178_p3, %p172_p0 }
  0x12   :  { %155 = vmatpush3.bf16.msra.mxu0 %v169_v5 }
  0x13   :  { %156 = vmatprep.subr.bf16.mxu0 %v195_v1 }
  0x16   :  { %157 = vmatpush3.bf16.msra.mxu0 %v74_v7 }
  0x19   :  { %159 = vmatmul.mubr.msk.bf16.vlgmr.msra.gmra.mrb[0].mxu0 %vm68_vm2, %v16_v8 }
  0xec   :  { %v110_v10 = vpop.f32.mrb[0].mxu0 }
  0xed   :  { %v111_v11 = vadd.f32 %v131_v9, %v110_v10  ;;  %v160_v12 = vpop.f32.mrb[1].mxu0 }
  0xee   :  { %v113_v13 = vpop.f32.mrb[2].mxu0 }
  0xef   :  { %116 = vst [vmem:[#allocation2] sm:$0x3] %v111_v11  ;;  %v161_v14 = vpop.f32.mrb[3].mxu0 }
  0xf0   :  { %182 = shalt.err (!%p179_p4)
}
  0xf1   :  { %s183_s2 = scalar_lea.hbm %s257_s3, 32 }
  0xf2   :  { %p184_p5 = scmp.ne.s32.totalorder %s257_s3, %s183_s2  ;;  %p187_p6 = scmp.lt.u32.totalorder %s183_s2, %s257_s3 }
  0xf4   :  { %p189_p7 = pnand %p187_p6, %p184_p5 }
  0xf6   :  { %192 = shalt.err (!%p189_p7)
}
  0xf7   :  { %126 = dma.vmem_to_hbm [thread:$0]  %s124_s29, 32, %s257_s3, [#allocation3]  }
  0xf8   :  { %193 = dma.done.wait [#allocation3], 32  }
  0xf9   :  { %194 = vsyncadd [#allocation3], 4294967264 }
  0xfa   :  { %130 = vsyncpa [#allocation3], 1 }

</bundles_post_ra>
